<compile_context>
chip_gen: v5e
topology: v5e:2x2
jax: 0.10.0
libtpu: 0.0.40
codegen_flags: <defaults>
</compile_context>

<pallas_src>
import math

import jax
import jax.numpy as jnp
from jax.experimental import pallas as pl

# ----------------------------- problem sizes -----------------------------
B, T, C, H, W = 2, 8, 4, 16, 16     # batch, sequence, channels, spatial
F = 8                               # conv output channels
D = 32                              # embedding / hidden dim
KH = KW = 3                         # conv kernel
N = B * T                           # number of images
HW = H * W
CK = C * KH * KW                    # im2col contraction dim
NHW = N * HW
INV_SQRT_D = 1.0 / math.sqrt(D)


# ----------------------------- fused Pallas kernel -----------------------------
def fused_model_kernel(p_ref, pool_ref, wct_ref, bc_ref, wf_ref, bf_ref,
                       wq_ref, wk_ref, wv_ref, wo_ref, bo_ref, wp_ref, bp_ref,
                       o_ref):
    # ---- image encoder: conv-as-matmul (lane-dense) + ReLU + avg-pool + Linear + ReLU ----
    # wct: (F, CK), patches: (CK, N*HW)  ->  conv_t: (F, N*HW), lane-dense output
    conv_t = jnp.dot(wct_ref[...], p_ref[...], preferred_element_type=jnp.float32)
    conv_t = jnp.maximum(conv_t + bc_ref[...], 0.0)                    # bias (F,1) bcast over lanes

    # global average pool as an MXU matmul: (N, N*HW) . (F, N*HW)^T -> (N, F)
    pooled = jax.lax.dot_general(pool_ref[...], conv_t, (((1,), (1,)), ((), ())),
                                 preferred_element_type=jnp.float32)

    emb = jnp.dot(pooled, wf_ref[...], preferred_element_type=jnp.float32) + bf_ref[...]
    emb = jnp.maximum(emb, 0.0)                                        # (N, D) = (B*T, D)

    # ---- sequence encoder: QKV/O projections batched over all tokens ----
    q = jnp.dot(emb, wq_ref[...], preferred_element_type=jnp.float32)  # (N, D)
    k = jnp.dot(emb, wk_ref[...], preferred_element_type=jnp.float32)
    v = jnp.dot(emb, wv_ref[...], preferred_element_type=jnp.float32)

    attn_rows = []
    for b in range(B):                                                 # B=2, static unroll
        lo = b * T
        qb = q[lo:lo + T, :]
        kb = k[lo:lo + T, :]
        vb = v[lo:lo + T, :]
        s = jax.lax.dot_general(qb, kb, (((1,), (1,)), ((), ())),
                                preferred_element_type=jnp.float32) * INV_SQRT_D   # (T, T)
        m = jnp.max(s, axis=-1, keepdims=True)
        e = jnp.exp(s - m)
        pb = e / jnp.sum(e, axis=-1, keepdims=True)                    # exact divide (tolerance)
        attn_rows.append(jnp.dot(pb, vb, preferred_element_type=jnp.float32))      # (T, D)
    a = jnp.concatenate(attn_rows, axis=0)                             # (N, D)

    h = emb + jnp.dot(a, wo_ref[...], preferred_element_type=jnp.float32) + bo_ref[...]

    # ---- prediction head: Linear(D -> 1), single full-block store ----
    o_ref[...] = jnp.dot(h, wp_ref[...], preferred_element_type=jnp.float32) + bp_ref[...]


# ----------------------------- glue / wrapper -----------------------------
def _im2col_ckhw(x):
    """x: [N, C, H, W] -> [N, CK, HW] with CK ordered (c, dy, dx) to match the weight flatten."""
    xpad = jnp.pad(x, ((0, 0), (0, 0), (1, 1), (1, 1)))
    shifts = [xpad[:, :, dy:dy + H, dx:dx + W] for dy in range(KH) for dx in range(KW)]
    p = jnp.stack(shifts, axis=2)                    # [N, C, 9, H, W]
    return p.reshape(N, CK, HW)


def _pool_matrix():
    """(N, N*HW) block-averaging matrix: row n has 1/HW over the HW columns of image n."""
    return jnp.kron(jnp.eye(N, dtype=jnp.float32), jnp.ones((1, HW), jnp.float32)) * (1.0 / HW)


@jax.jit
def model_forward(X, params):
    # X: [B, T, C, H, W]
    x = X.reshape(N, C, H, W).astype(jnp.float32)
    p = _im2col_ckhw(x)                                          # [N, CK, HW]
    patches_t = jnp.transpose(p, (1, 0, 2)).reshape(CK, NHW)     # lane-dense [CK, N*HW]
    pool_t = _pool_matrix()                                      # [N, N*HW]

    y = pl.pallas_call(
        fused_model_kernel,
        out_shape=jax.ShapeDtypeStruct((N, 1), jnp.float32),
        # no grid: single invocation, every operand resident in VMEM for the whole kernel
    )(patches_t, pool_t,
      params["wc"].T,            # (F, CK)   conv weight, transposed for lane-dense matmul
      params["bc"].T,            # (F, 1)    conv bias as a column (broadcasts over lanes)
      params["wf"], params["bf"],
      params["wq"], params["wk"], params["wv"], params["wo"], params["bo"],
      params["wp"], params["bp"])
    return y.reshape(B, T, 1)


# ----------------------------- pure-JAX reference -----------------------------
def reference_forward(X, params):
    x = X.reshape(N, C, H, W).astype(jnp.float32)
    patches = jnp.transpose(_im2col_ckhw(x), (0, 2, 1))                # [N, HW, CK]
    conv = jnp.maximum(patches @ params["wc"] + params["bc"], 0.0)     # [N, HW, F]
    pooled = conv.mean(axis=1)                                         # [N, F]
    emb = jnp.maximum(pooled @ params["wf"] + params["bf"], 0.0)       # [N, D]
    h = emb.reshape(B, T, D)
    q = h @ params["wq"]; k = h @ params["wk"]; v = h @ params["wv"]
    s = jnp.einsum("btd,bsd->bts", q, k) / math.sqrt(D)
    p = jax.nn.softmax(s, axis=-1)
    h = h + jnp.einsum("bts,bsd->btd", p, v) @ params["wo"] + params["bo"]
    return h @ params["wp"] + params["bp"]                             # [B, T, 1]


# ----------------------------- params -----------------------------
def make_params(key):
    ks = jax.random.split(key, 10)
    sc = lambda fan_in: 1.0 / math.sqrt(fan_in)
    return {
        # conv weight flattened [C*3*3, F] (order c, dy, dx on contraction axis)
        "wc": jax.random.normal(ks[0], (CK, F), jnp.float32) * sc(CK),
        "bc": jax.random.normal(ks[1], (1, F), jnp.float32) * 0.1,
        "wf": jax.random.normal(ks[2], (F, D), jnp.float32) * sc(F),
        "bf": jax.random.normal(ks[3], (1, D), jnp.float32) * 0.1,
        "wq": jax.random.normal(ks[4], (D, D), jnp.float32) * sc(D),
        "wk": jax.random.normal(ks[5], (D, D), jnp.float32) * sc(D),
        "wv": jax.random.normal(ks[6], (D, D), jnp.float32) * sc(D),
        "wo": jax.random.normal(ks[7], (D, D), jnp.float32) * sc(D),
        "bo": jax.random.normal(ks[8], (1, D), jnp.float32) * 0.1,
        "wp": jax.random.normal(ks[9], (D, 1), jnp.float32) * sc(D),
        "bp": jnp.zeros((1, 1), jnp.float32),
    }


if __name__ == "__main__":
    key = jax.random.PRNGKey(0)
    kx, kp = jax.random.split(key)
    X = jax.random.normal(kx, (B, T, C, H, W), jnp.float32)
    params = make_params(kp)

    y = jax.block_until_ready(model_forward(X, params))
    y_ref = jax.block_until_ready(reference_forward(X, params))

    assert y.shape == (B, T, 1)
    assert jnp.allclose(y, y_ref, rtol=1e-4, atol=1e-4), "mismatch vs pure-JAX reference"

    print("KERNEL_OK")
</pallas_src>

<mosaic_0001>
module attributes {stable_mosaic.version = 11 : i64} {
  func.func @fused_model_kernel(%arg0: memref<36x4096xf32, #tpu.memory_space<vmem>>, %arg1: memref<16x4096xf32, #tpu.memory_space<vmem>>, %arg2: memref<8x36xf32, #tpu.memory_space<vmem>>, %arg3: memref<8x1xf32, #tpu.memory_space<vmem>>, %arg4: memref<8x32xf32, #tpu.memory_space<vmem>>, %arg5: memref<1x32xf32, #tpu.memory_space<vmem>>, %arg6: memref<32x32xf32, #tpu.memory_space<vmem>>, %arg7: memref<32x32xf32, #tpu.memory_space<vmem>>, %arg8: memref<32x32xf32, #tpu.memory_space<vmem>>, %arg9: memref<32x32xf32, #tpu.memory_space<vmem>>, %arg10: memref<1x32xf32, #tpu.memory_space<vmem>>, %arg11: memref<32x1xf32, #tpu.memory_space<vmem>>, %arg12: memref<1x1xf32, #tpu.memory_space<vmem>>, %arg13: memref<16x1xf32, #tpu.memory_space<vmem>>) attributes {dimension_semantics = [], scalar_prefetch = 0 : i64, scratch_operands = 0 : i64, tpu.core_type = #tpu.core_type<tc>} {
    %c0 = arith.constant 0 : index
    %c0_0 = arith.constant 0 : index
    %0 = vector.load %arg2[%c0, %c0_0] : memref<8x36xf32, #tpu.memory_space<vmem>>, vector<8x36xf32>
    %c0_1 = arith.constant 0 : index
    %c0_2 = arith.constant 0 : index
    %1 = vector.load %arg0[%c0_1, %c0_2] : memref<36x4096xf32, #tpu.memory_space<vmem>>, vector<36x4096xf32>
    %cst = arith.constant dense<0.000000e+00> : vector<8x4096xf32>
    %2 = tpu.matmul %0, %1, %cst {dimension_numbers = #tpu.dot_dimension_numbers<[1], [0], [0], [1], [0, 0, 1, 1], [], []>} : vector<8x36xf32>, vector<36x4096xf32>, vector<8x4096xf32> -> vector<8x4096xf32>
    %c0_3 = arith.constant 0 : index
    %c0_4 = arith.constant 0 : index
    %3 = vector.load %arg3[%c0_3, %c0_4] : memref<8x1xf32, #tpu.memory_space<vmem>>, vector<8x1xf32>
    %4 = vector.broadcast %3 : vector<8x1xf32> to vector<8x4096xf32>
    %5 = arith.addf %2, %4 : vector<8x4096xf32>
    %cst_5 = arith.constant 0.000000e+00 : f32
    %6 = vector.broadcast %cst_5 : f32 to vector<8x4096xf32>
    %7 = arith.maximumf %5, %6 : vector<8x4096xf32>
    %c0_6 = arith.constant 0 : index
    %c0_7 = arith.constant 0 : index
    %8 = vector.load %arg1[%c0_6, %c0_7] : memref<16x4096xf32, #tpu.memory_space<vmem>>, vector<16x4096xf32>
    %cst_8 = arith.constant dense<0.000000e+00> : vector<16x8xf32>
    %9 = tpu.matmul %8, %7, %cst_8 {dimension_numbers = #tpu.dot_dimension_numbers<[1], [1], [0], [0], [0, 0, 1, 0], [], []>} : vector<16x4096xf32>, vector<8x4096xf32>, vector<16x8xf32> -> vector<16x8xf32>
    %c0_9 = arith.constant 0 : index
    %c0_10 = arith.constant 0 : index
    %10 = vector.load %arg4[%c0_9, %c0_10] : memref<8x32xf32, #tpu.memory_space<vmem>>, vector<8x32xf32>
    %cst_11 = arith.constant dense<0.000000e+00> : vector<16x32xf32>
    %11 = tpu.matmul %9, %10, %cst_11 {dimension_numbers = #tpu.dot_dimension_numbers<[1], [0], [0], [1], [0, 0, 1, 1], [], []>} : vector<16x8xf32>, vector<8x32xf32>, vector<16x32xf32> -> vector<16x32xf32>
    %c0_12 = arith.constant 0 : index
    %c0_13 = arith.constant 0 : index
    %12 = vector.load %arg5[%c0_12, %c0_13] : memref<1x32xf32, #tpu.memory_space<vmem>>, vector<1x32xf32>
    %13 = vector.broadcast %12 : vector<1x32xf32> to vector<16x32xf32>
    %14 = arith.addf %11, %13 : vector<16x32xf32>
    %cst_14 = arith.constant 0.000000e+00 : f32
    %15 = vector.broadcast %cst_14 : f32 to vector<16x32xf32>
    %16 = arith.maximumf %14, %15 : vector<16x32xf32>
    %c0_15 = arith.constant 0 : index
    %c0_16 = arith.constant 0 : index
    %17 = vector.load %arg6[%c0_15, %c0_16] : memref<32x32xf32, #tpu.memory_space<vmem>>, vector<32x32xf32>
    %cst_17 = arith.constant dense<0.000000e+00> : vector<16x32xf32>
    %18 = tpu.matmul %16, %17, %cst_17 {dimension_numbers = #tpu.dot_dimension_numbers<[1], [0], [0], [1], [0, 0, 1, 1], [], []>} : vector<16x32xf32>, vector<32x32xf32>, vector<16x32xf32> -> vector<16x32xf32>
    %c0_18 = arith.constant 0 : index
    %c0_19 = arith.constant 0 : index
    %19 = vector.load %arg7[%c0_18, %c0_19] : memref<32x32xf32, #tpu.memory_space<vmem>>, vector<32x32xf32>
    %cst_20 = arith.constant dense<0.000000e+00> : vector<16x32xf32>
    %20 = tpu.matmul %16, %19, %cst_20 {dimension_numbers = #tpu.dot_dimension_numbers<[1], [0], [0], [1], [0, 0, 1, 1], [], []>} : vector<16x32xf32>, vector<32x32xf32>, vector<16x32xf32> -> vector<16x32xf32>
    %c0_21 = arith.constant 0 : index
    %c0_22 = arith.constant 0 : index
    %21 = vector.load %arg8[%c0_21, %c0_22] : memref<32x32xf32, #tpu.memory_space<vmem>>, vector<32x32xf32>
    %cst_23 = arith.constant dense<0.000000e+00> : vector<16x32xf32>
    %22 = tpu.matmul %16, %21, %cst_23 {dimension_numbers = #tpu.dot_dimension_numbers<[1], [0], [0], [1], [0, 0, 1, 1], [], []>} : vector<16x32xf32>, vector<32x32xf32>, vector<16x32xf32> -> vector<16x32xf32>
    %23 = vector.extract_strided_slice %18 {offsets = [0, 0], sizes = [8, 32], strides = [1, 1]} : vector<16x32xf32> to vector<8x32xf32>
    %24 = vector.extract_strided_slice %20 {offsets = [0, 0], sizes = [8, 32], strides = [1, 1]} : vector<16x32xf32> to vector<8x32xf32>
    %25 = vector.extract_strided_slice %22 {offsets = [0, 0], sizes = [8, 32], strides = [1, 1]} : vector<16x32xf32> to vector<8x32xf32>
    %cst_24 = arith.constant dense<0.000000e+00> : vector<8x8xf32>
    %26 = tpu.matmul %23, %24, %cst_24 {dimension_numbers = #tpu.dot_dimension_numbers<[1], [1], [0], [0], [0, 0, 1, 0], [], []>} : vector<8x32xf32>, vector<8x32xf32>, vector<8x8xf32> -> vector<8x8xf32>
    %cst_25 = arith.constant 0.176776692 : f32
    %27 = vector.broadcast %cst_25 : f32 to vector<8x8xf32>
    %28 = arith.mulf %26, %27 : vector<8x8xf32>
    %cst_26 = arith.constant dense<0xFF800000> : vector<8xf32>
    %29 = vector.multi_reduction <maximumf>, %28, %cst_26 [1] : vector<8x8xf32> to vector<8xf32>
    %30 = vector.shape_cast %29 : vector<8xf32> to vector<8x1xf32>
    %31 = vector.broadcast %30 : vector<8x1xf32> to vector<8x8xf32>
    %32 = arith.subf %28, %31 : vector<8x8xf32>
    %33 = math.exp %32 : vector<8x8xf32>
    %cst_27 = arith.constant dense<0.000000e+00> : vector<8xf32>
    %34 = vector.multi_reduction <add>, %33, %cst_27 [1] : vector<8x8xf32> to vector<8xf32>
    %35 = vector.shape_cast %34 : vector<8xf32> to vector<8x1xf32>
    %36 = vector.broadcast %35 : vector<8x1xf32> to vector<8x8xf32>
    %37 = arith.divf %33, %36 : vector<8x8xf32>
    %cst_28 = arith.constant dense<0.000000e+00> : vector<8x32xf32>
    %38 = tpu.matmul %37, %25, %cst_28 {dimension_numbers = #tpu.dot_dimension_numbers<[1], [0], [0], [1], [0, 0, 1, 1], [], []>} : vector<8x8xf32>, vector<8x32xf32>, vector<8x32xf32> -> vector<8x32xf32>
    %39 = vector.extract_strided_slice %18 {offsets = [8, 0], sizes = [8, 32], strides = [1, 1]} : vector<16x32xf32> to vector<8x32xf32>
    %40 = vector.extract_strided_slice %20 {offsets = [8, 0], sizes = [8, 32], strides = [1, 1]} : vector<16x32xf32> to vector<8x32xf32>
    %41 = vector.extract_strided_slice %22 {offsets = [8, 0], sizes = [8, 32], strides = [1, 1]} : vector<16x32xf32> to vector<8x32xf32>
    %cst_29 = arith.constant dense<0.000000e+00> : vector<8x8xf32>
    %42 = tpu.matmul %39, %40, %cst_29 {dimension_numbers = #tpu.dot_dimension_numbers<[1], [1], [0], [0], [0, 0, 1, 0], [], []>} : vector<8x32xf32>, vector<8x32xf32>, vector<8x8xf32> -> vector<8x8xf32>
    %cst_30 = arith.constant 0.176776692 : f32
    %43 = vector.broadcast %cst_30 : f32 to vector<8x8xf32>
    %44 = arith.mulf %42, %43 : vector<8x8xf32>
    %cst_31 = arith.constant dense<0xFF800000> : vector<8xf32>
    %45 = vector.multi_reduction <maximumf>, %44, %cst_31 [1] : vector<8x8xf32> to vector<8xf32>
    %46 = vector.shape_cast %45 : vector<8xf32> to vector<8x1xf32>
    %47 = vector.broadcast %46 : vector<8x1xf32> to vector<8x8xf32>
    %48 = arith.subf %44, %47 : vector<8x8xf32>
    %49 = math.exp %48 : vector<8x8xf32>
    %cst_32 = arith.constant dense<0.000000e+00> : vector<8xf32>
    %50 = vector.multi_reduction <add>, %49, %cst_32 [1] : vector<8x8xf32> to vector<8xf32>
    %51 = vector.shape_cast %50 : vector<8xf32> to vector<8x1xf32>
    %52 = vector.broadcast %51 : vector<8x1xf32> to vector<8x8xf32>
    %53 = arith.divf %49, %52 : vector<8x8xf32>
    %cst_33 = arith.constant dense<0.000000e+00> : vector<8x32xf32>
    %54 = tpu.matmul %53, %41, %cst_33 {dimension_numbers = #tpu.dot_dimension_numbers<[1], [0], [0], [1], [0, 0, 1, 1], [], []>} : vector<8x8xf32>, vector<8x32xf32>, vector<8x32xf32> -> vector<8x32xf32>
    %55 = tpu.concatenate %38, %54 in 0 : vector<8x32xf32>, vector<8x32xf32> -> vector<16x32xf32>
    %c0_34 = arith.constant 0 : index
    %c0_35 = arith.constant 0 : index
    %56 = vector.load %arg9[%c0_34, %c0_35] : memref<32x32xf32, #tpu.memory_space<vmem>>, vector<32x32xf32>
    %cst_36 = arith.constant dense<0.000000e+00> : vector<16x32xf32>
    %57 = tpu.matmul %55, %56, %cst_36 {dimension_numbers = #tpu.dot_dimension_numbers<[1], [0], [0], [1], [0, 0, 1, 1], [], []>} : vector<16x32xf32>, vector<32x32xf32>, vector<16x32xf32> -> vector<16x32xf32>
    %58 = arith.addf %16, %57 : vector<16x32xf32>
    %c0_37 = arith.constant 0 : index
    %c0_38 = arith.constant 0 : index
    %59 = vector.load %arg10[%c0_37, %c0_38] : memref<1x32xf32, #tpu.memory_space<vmem>>, vector<1x32xf32>
    %60 = vector.broadcast %59 : vector<1x32xf32> to vector<16x32xf32>
    %61 = arith.addf %58, %60 : vector<16x32xf32>
    %c0_39 = arith.constant 0 : index
    %c0_40 = arith.constant 0 : index
    %62 = vector.load %arg11[%c0_39, %c0_40] : memref<32x1xf32, #tpu.memory_space<vmem>>, vector<32x1xf32>
    %cst_41 = arith.constant dense<0.000000e+00> : vector<16x1xf32>
    %63 = tpu.matmul %61, %62, %cst_41 {dimension_numbers = #tpu.dot_dimension_numbers<[1], [0], [0], [1], [0, 0, 1, 1], [], []>} : vector<16x32xf32>, vector<32x1xf32>, vector<16x1xf32> -> vector<16x1xf32>
    %c0_42 = arith.constant 0 : index
    %c0_43 = arith.constant 0 : index
    %64 = vector.load %arg12[%c0_42, %c0_43] : memref<1x1xf32, #tpu.memory_space<vmem>>, vector<1x1xf32>
    %65 = vector.broadcast %64 : vector<1x1xf32> to vector<16x1xf32>
    %66 = arith.addf %63, %65 : vector<16x1xf32>
    %c0_44 = arith.constant 0 : index
    %c0_45 = arith.constant 0 : index
    %67 = vector.load %arg13[%c0_44, %c0_45] : memref<16x1xf32, #tpu.memory_space<vmem>>, vector<16x1xf32>
    tpu.vector_store %arg13[%c0_44, %c0_45], %66 {strides = array<i32>} : memref<16x1xf32, #tpu.memory_space<vmem>>, vector<16x1xf32>,
    return
  }
}

</mosaic_0001>

<bundles_post_ra>
// kernel: model_forward.1
= control target key start
LH: loop header
LB: loop body
LE: loop exit
PB: predicated region body
PF: predicated region fallthrough
CT: control target
= control target key end

     0   :  { %vm217_vm0 = vcmask 1043456   ;;  %v2241_v3 = vmov 0   ;;  %vm213_vm1 = vcmask 293888   ;;  %vm1791_vm2 = vcmask 64512   ;;  %s3234_s0 = inlined_call_operand.vmem [shape: f32[36,4096], index: 0, kind: input, shape index: {}]   ;;  %s3235_s2 = inlined_call_operand.vmem [shape: f32[8,36], index: 2, kind: input, shape index: {}]   ;;  %s3236_s3 = inlined_call_operand.vmem [shape: f32[8,1], index: 3, kind: input, shape index: {}]   ;;  %s3237_s1 = inlined_call_operand.vmem [shape: f32[16,4096], index: 1, kind: input, shape index: {}]   ;;  %s3238_s5 = inlined_call_operand.vmem [shape: f32[1,32], index: 5, kind: input, shape index: {}]   ;;  %s3239_s4 = inlined_call_operand.vmem [shape: f32[8,32], index: 4, kind: input, shape index: {}]   ;;  %s3240_s6 = inlined_call_operand.vmem [shape: f32[32,32], index: 6, kind: input, shape index: {}]   ;;  %s3241_s7 = inlined_call_operand.vmem [shape: f32[32,32], index: 7, kind: input, shape index: {}]   ;;  %s3242_s8 = inlined_call_operand.vmem [shape: f32[32,32], index: 8, kind: input, shape index: {}]   ;;  %s3243_s9 = inlined_call_operand.vmem [shape: f32[32,32], index: 9, kind: input, shape index: {}]   ;;  %s3244_s10 = inlined_call_operand.vmem [shape: f32[1,32], index: 10, kind: input, shape index: {}]   ;;  %s3245_s11 = inlined_call_operand.vmem [shape: f32[32,1], index: 11, kind: input, shape index: {}]   ;;  %s3246_s12 = inlined_call_operand.<no memory space> [shape: f32[1,1], index: 12, kind: input, shape index: {}]   ;;  %s3247_s13 = inlined_call_operand.vmem [shape: f32[16,1], index: 13, kind: output, shape index: {}]  }
   0x1   :  { %v175_v0 = vld [vmem:[%s3234_s0 + $0x400] sm:$0xf]  ;;  %v176_v1 = vld [vmem:[%s3234_s0 + $0x408] sm:$0xf]  ;;  %v177_v2 = vld [vmem:[%s3234_s0 + $0x410] sm:$0xf]  ;;  %2229 = vset.pattern.permute.xlu0 %v2241_v3 }
   0x2   :  { %2144 = vmatpush.msk.msra.mxu0 %vm217_vm0, %v175_v0  ;;  %2146 = vmatpush.msk.msra.mxu1 %vm217_vm0, %v176_v1  ;;  %v178_v4 = vld [vmem:[%s3234_s0 + $0x418] sm:$0xf]  ;;  %v143_v5 = vld [vmem:[%s3234_s0 + $0x300] sm:$0xff]  ;;  %v144_v6 = vld [vmem:[%s3234_s0 + $0x308] sm:$0xff]  ;;  %vm1827_vm3 = vcmask 261120   ;;  %vm2137_vm12 = vcmask 7168  }
   0x3   :  { %2148 = vmatpush.msk.msra.mxu2 %vm217_vm0, %v177_v2  ;;  %2150 = vmatpush.msk.msra.mxu3 %vm217_vm0, %v178_v4  ;;  %v145_v7 = vld [vmem:[%s3234_s0 + $0x310] sm:$0xff]  ;;  %v146_v8 = vld [vmem:[%s3234_s0 + $0x318] sm:$0xff]  ;;  %v111_v9 = vld [vmem:[%s3234_s0 + $0x200] sm:$0xff] }
   0x4   :  { %326 = vmatpush.msra.mxu0 %v143_v5  ;;  %346 = vmatpush.msra.mxu1 %v144_v6  ;;  %v112_v10 = vld [vmem:[%s3234_s0 + $0x208] sm:$0xff]  ;;  %v113_v11 = vld [vmem:[%s3234_s0 + $0x210] sm:$0xff]  ;;  %v114_v12 = vld [vmem:[%s3234_s0 + $0x218] sm:$0xff] }
   0x5   :  { %366 = vmatpush.msra.mxu2 %v145_v7  ;;  %386 = vmatpush.msra.mxu3 %v146_v8  ;;  %v79_v13 = vld [vmem:[%s3234_s0 + $0x100] sm:$0xff]  ;;  %v80_v14 = vld [vmem:[%s3234_s0 + $0x108] sm:$0xff]  ;;  %v81_v15 = vld [vmem:[%s3234_s0 + $0x110] sm:$0xff] }
   0x6   :  { %327 = vmatpush.msra.mxu0 %v111_v9  ;;  %347 = vmatpush.msra.mxu1 %v112_v10  ;;  %v82_v16 = vld [vmem:[%s3234_s0 + $0x118] sm:$0xff]  ;;  %v47_v17 = vld [vmem:[%s3234_s0] sm:$0xff]  ;;  %v48_v18 = vld [vmem:[%s3234_s0 + $0x8] sm:$0xff] }
   0x7   :  { %367 = vmatpush.msra.mxu2 %v113_v11  ;;  %387 = vmatpush.msra.mxu3 %v114_v12  ;;  %v49_v19 = vld [vmem:[%s3234_s0 + $0x10] sm:$0xff]  ;;  %v50_v20 = vld [vmem:[%s3234_s0 + $0x18] sm:$0xff]  ;;  %v2379_v21 = vld [vmem:[%s3235_s2] sm:$0xff] }
   0x8   :  { %328 = vmatpush.msra.mxu0 %v79_v13  ;;  %348 = vmatpush.msra.mxu1 %v80_v14  ;;  %v179_v22 = vld [vmem:[%s3234_s0 + $0x420] sm:$0xf]  ;;  %v180_v23 = vld [vmem:[%s3234_s0 + $0x428] sm:$0xf]  ;;  %v181_v24 = vld [vmem:[%s3234_s0 + $0x430] sm:$0xf] }
   0x9   :  { %368 = vmatpush.msra.mxu2 %v81_v15  ;;  %388 = vmatpush.msra.mxu3 %v82_v16  ;;  %v182_v25 = vld [vmem:[%s3234_s0 + $0x438] sm:$0xf]  ;;  %v147_v26 = vld [vmem:[%s3234_s0 + $0x320] sm:$0xff]  ;;  %v148_v27 = vld [vmem:[%s3234_s0 + $0x328] sm:$0xff] }
   0xa   :  { %329 = vmatpush.msra.mxu0 %v47_v17  ;;  %349 = vmatpush.msra.mxu1 %v48_v18  ;;  %v149_v28 = vld [vmem:[%s3234_s0 + $0x330] sm:$0xff]  ;;  %v150_v29 = vld [vmem:[%s3234_s0 + $0x338] sm:$0xff]  ;;  %v115_v30 = vld [vmem:[%s3234_s0 + $0x220] sm:$0xff] }
   0xb   :  { %369 = vmatpush.msra.mxu2 %v49_v19  ;;  %389 = vmatpush.msra.mxu3 %v50_v20  ;;  %v116_v31 = vld [vmem:[%s3234_s0 + $0x228] sm:$0xff]  ;;  %v117_v32 = vld [vmem:[%s3234_s0 + $0x230] sm:$0xff]  ;;  %v118_v33 = vld [vmem:[%s3234_s0 + $0x238] sm:$0xff] }
   0xc   :  { %2145 = vmatmul.msk.f32.vlgmr.msra.gmra.mxu0 %vm213_vm1, %v2379_v21  ;;  %2147 = vmatmul.msk.f32.vlgmr.msra.gmra.mxu1 %vm213_vm1, %v2379_v21  ;;  %v83_v34 = vld [vmem:[%s3234_s0 + $0x120] sm:$0xff]  ;;  %v84_v35 = vld [vmem:[%s3234_s0 + $0x128] sm:$0xff]  ;;  %v85_v36 = vld [vmem:[%s3234_s0 + $0x130] sm:$0xff] }
   0xd   :  { %2149 = vmatmul.msk.f32.vlgmr.msra.gmra.mxu2 %vm213_vm1, %v2379_v21  ;;  %2151 = vmatmul.msk.f32.vlgmr.msra.gmra.mxu3 %vm213_vm1, %v2379_v21  ;;  %v86_v37 = vld [vmem:[%s3234_s0 + $0x138] sm:$0xff]  ;;  %v51_v38 = vld [vmem:[%s3234_s0 + $0x20] sm:$0xff]  ;;  %v52_v39 = vld [vmem:[%s3234_s0 + $0x28] sm:$0xff] }
   0xe   :  { %2152 = vmatpush.msk.msrb.mxu0 %vm217_vm0, %v179_v22  ;;  %2154 = vmatpush.msk.msrb.mxu1 %vm217_vm0, %v180_v23  ;;  %v53_v40 = vld [vmem:[%s3234_s0 + $0x30] sm:$0xff]  ;;  %v54_v41 = vld [vmem:[%s3234_s0 + $0x38] sm:$0xff]  ;;  %v183_v42 = vld [vmem:[%s3234_s0 + $0x440] sm:$0xf] }
   0xf   :  { %2156 = vmatpush.msk.msrb.mxu2 %vm217_vm0, %v181_v24  ;;  %2158 = vmatpush.msk.msrb.mxu3 %vm217_vm0, %v182_v25  ;;  %v184_v43 = vld [vmem:[%s3234_s0 + $0x448] sm:$0xf]  ;;  %v185_v44 = vld [vmem:[%s3234_s0 + $0x450] sm:$0xf]  ;;  %v186_v45 = vld [vmem:[%s3234_s0 + $0x458] sm:$0xf] }
  0x10   :  { %406 = vmatpush.msrb.mxu0 %v147_v26  ;;  %426 = vmatpush.msrb.mxu1 %v148_v27  ;;  %v207_v46 = vld [vmem:[%s3236_s3] sm:$0xff]  ;;  %v152_v48 = vld [vmem:[%s3234_s0 + $0x348] sm:$0xff]  ;;  %v153_v49 = vld [vmem:[%s3234_s0 + $0x350] sm:$0xff] }
  0x11   :  { %446 = vmatpush.msrb.mxu2 %v149_v28  ;;  %466 = vmatpush.msrb.mxu3 %v150_v29  ;;  %v151_v47 = vld [vmem:[%s3234_s0 + $0x340] sm:$0xff]  ;;  %v154_v50 = vld [vmem:[%s3234_s0 + $0x358] sm:$0xff]  ;;  %v120_v52 = vld [vmem:[%s3234_s0 + $0x248] sm:$0xff] }
  0x12   :  { %407 = vmatpush.msrb.mxu0 %v115_v30  ;;  %427 = vmatpush.msrb.mxu1 %v116_v31  ;;  %v119_v51 = vld [vmem:[%s3234_s0 + $0x240] sm:$0xff]  ;;  %v121_v53 = vld [vmem:[%s3234_s0 + $0x250] sm:$0xff]  ;;  %v122_v54 = vld [vmem:[%s3234_s0 + $0x258] sm:$0xff] }
  0x13   :  { %447 = vmatpush.msrb.mxu2 %v117_v32  ;;  %467 = vmatpush.msrb.mxu3 %v118_v33  ;;  %v87_v55 = vld [vmem:[%s3234_s0 + $0x140] sm:$0xff]  ;;  %v88_v56 = vld [vmem:[%s3234_s0 + $0x148] sm:$0xff]  ;;  %v89_v57 = vld [vmem:[%s3234_s0 + $0x150] sm:$0xff] }
  0x14   :  { %408 = vmatpush.msrb.mxu0 %v83_v34  ;;  %428 = vmatpush.msrb.mxu1 %v84_v35  ;;  %v90_v58 = vld [vmem:[%s3234_s0 + $0x158] sm:$0xff]  ;;  %v55_v59 = vld [vmem:[%s3234_s0 + $0x40] sm:$0xff]  ;;  %v56_v60 = vld [vmem:[%s3234_s0 + $0x48] sm:$0xff] }
  0x15   :  { %448 = vmatpush.msrb.mxu2 %v85_v36  ;;  %468 = vmatpush.msrb.mxu3 %v86_v37  ;;  %v57_v61 = vld [vmem:[%s3234_s0 + $0x50] sm:$0xff]  ;;  %v58_v62 = vld [vmem:[%s3234_s0 + $0x58] sm:$0xff]  ;;  %v187_v63 = vld [vmem:[%s3234_s0 + $0x460] sm:$0xf] }
  0x16   :  { %409 = vmatpush.msrb.mxu0 %v51_v38  ;;  %429 = vmatpush.msrb.mxu1 %v52_v39  ;;  %v188_v0 = vld [vmem:[%s3234_s0 + $0x468] sm:$0xf]  ;;  %v189_v1 = vld [vmem:[%s3234_s0 + $0x470] sm:$0xf]  ;;  %v190_v2 = vld [vmem:[%s3234_s0 + $0x478] sm:$0xf] }
  0x17   :  { %449 = vmatpush.msrb.mxu2 %v53_v40  ;;  %469 = vmatpush.msrb.mxu3 %v54_v41  ;;  %v155_v3 = vld [vmem:[%s3234_s0 + $0x360] sm:$0xff]  ;;  %v156_v4 = vld [vmem:[%s3234_s0 + $0x368] sm:$0xff]  ;;  %v157_v5 = vld [vmem:[%s3234_s0 + $0x370] sm:$0xff] }
  0x18   :  { %2153 = vmatmul.msk.f32.vlgmr.msrb.gmra.mxu0 %vm213_vm1, %v2379_v21  ;;  %2155 = vmatmul.msk.f32.vlgmr.msrb.gmra.mxu1 %vm213_vm1, %v2379_v21  ;;  %v158_v6 = vld [vmem:[%s3234_s0 + $0x378] sm:$0xff]  ;;  %v123_v7 = vld [vmem:[%s3234_s0 + $0x260] sm:$0xff]  ;;  %v124_v8 = vld [vmem:[%s3234_s0 + $0x268] sm:$0xff] }
  0x19   :  { %2157 = vmatmul.msk.f32.vlgmr.msrb.gmra.mxu2 %vm213_vm1, %v2379_v21  ;;  %2159 = vmatmul.msk.f32.vlgmr.msrb.gmra.mxu3 %vm213_vm1, %v2379_v21  ;;  %v125_v9 = vld [vmem:[%s3234_s0 + $0x270] sm:$0xff]  ;;  %v126_v10 = vld [vmem:[%s3234_s0 + $0x278] sm:$0xff]  ;;  %v91_v11 = vld [vmem:[%s3234_s0 + $0x160] sm:$0xff] }
  0x1a   :  { %2160 = vmatpush.msk.msra.mxu0 %vm217_vm0, %v183_v42  ;;  %2162 = vmatpush.msk.msra.mxu1 %vm217_vm0, %v184_v43  ;;  %v92_v12 = vld [vmem:[%s3234_s0 + $0x168] sm:$0xff]  ;;  %v93_v13 = vld [vmem:[%s3234_s0 + $0x170] sm:$0xff]  ;;  %v94_v14 = vld [vmem:[%s3234_s0 + $0x178] sm:$0xff] }
  0x1b   :  { %2164 = vmatpush.msk.msra.mxu2 %vm217_vm0, %v185_v44  ;;  %2166 = vmatpush.msk.msra.mxu3 %vm217_vm0, %v186_v45  ;;  %v59_v15 = vld [vmem:[%s3234_s0 + $0x60] sm:$0xff]  ;;  %v60_v16 = vld [vmem:[%s3234_s0 + $0x68] sm:$0xff]  ;;  %v61_v17 = vld [vmem:[%s3234_s0 + $0x70] sm:$0xff] }
  0x1c   :  { %210 = vperm.xlu0 %2229, %v207_v46   ;;  %486 = vmatpush.msra.mxu0 %v151_v47  ;;  %v62_v18 = vld [vmem:[%s3234_s0 + $0x78] sm:$0xff]  ;;  %v191_v19 = vld [vmem:[%s3234_s0 + $0x480] sm:$0xf]  ;;  %v192_v20 = vld [vmem:[%s3234_s0 + $0x488] sm:$0xf] }
  0x1d   :  { %506 = vmatpush.msra.mxu1 %v152_v48  ;;  %526 = vmatpush.msra.mxu2 %v153_v49  ;;  %v193_v22 = vld [vmem:[%s3234_s0 + $0x490] sm:$0xf]  ;;  %v194_v23 = vld [vmem:[%s3234_s0 + $0x498] sm:$0xf]  ;;  %v159_v24 = vld [vmem:[%s3234_s0 + $0x380] sm:$0xff] }
  0x1e   :  { %546 = vmatpush.msra.mxu3 %v154_v50  ;;  %487 = vmatpush.msra.mxu0 %v119_v51  ;;  %v160_v25 = vld [vmem:[%s3234_s0 + $0x388] sm:$0xff]  ;;  %v161_v26 = vld [vmem:[%s3234_s0 + $0x390] sm:$0xff]  ;;  %v162_v27 = vld [vmem:[%s3234_s0 + $0x398] sm:$0xff] }
  0x1f   :  { %507 = vmatpush.msra.mxu1 %v120_v52  ;;  %527 = vmatpush.msra.mxu2 %v121_v53  ;;  %v127_v28 = vld [vmem:[%s3234_s0 + $0x280] sm:$0xff]  ;;  %v128_v29 = vld [vmem:[%s3234_s0 + $0x288] sm:$0xff]  ;;  %v129_v30 = vld [vmem:[%s3234_s0 + $0x290] sm:$0xff] }
  0x20   :  { %547 = vmatpush.msra.mxu3 %v122_v54  ;;  %488 = vmatpush.msra.mxu0 %v87_v55  ;;  %v130_v31 = vld [vmem:[%s3234_s0 + $0x298] sm:$0xff]  ;;  %v95_v32 = vld [vmem:[%s3234_s0 + $0x180] sm:$0xff]  ;;  %v96_v33 = vld [vmem:[%s3234_s0 + $0x188] sm:$0xff] }
  0x21   :  { %508 = vmatpush.msra.mxu1 %v88_v56  ;;  %528 = vmatpush.msra.mxu2 %v89_v57  ;;  %v97_v34 = vld [vmem:[%s3234_s0 + $0x190] sm:$0xff]  ;;  %v98_v35 = vld [vmem:[%s3234_s0 + $0x198] sm:$0xff]  ;;  %v63_v36 = vld [vmem:[%s3234_s0 + $0x80] sm:$0xff] }
  0x22   :  { %548 = vmatpush.msra.mxu3 %v90_v58  ;;  %489 = vmatpush.msra.mxu0 %v55_v59  ;;  %v64_v37 = vld [vmem:[%s3234_s0 + $0x88] sm:$0xff]  ;;  %v65_v38 = vld [vmem:[%s3234_s0 + $0x90] sm:$0xff]  ;;  %v66_v39 = vld [vmem:[%s3234_s0 + $0x98] sm:$0xff] }
  0x23   :  { %509 = vmatpush.msra.mxu1 %v56_v60  ;;  %529 = vmatpush.msra.mxu2 %v57_v61  ;;  %v195_v40 = vld [vmem:[%s3234_s0 + $0x4a0] sm:$0xf]  ;;  %v196_v41 = vld [vmem:[%s3234_s0 + $0x4a8] sm:$0xf]  ;;  %v197_v42 = vld [vmem:[%s3234_s0 + $0x4b0] sm:$0xf] }
  0x24   :  { %549 = vmatpush.msra.mxu3 %v58_v62  ;;  %2161 = vmatmul.msk.f32.vlgmr.msra.gmra.mxu0 %vm213_vm1, %v2379_v21  ;;  %v198_v43 = vld [vmem:[%s3234_s0 + $0x4b8] sm:$0xf]  ;;  %v163_v44 = vld [vmem:[%s3234_s0 + $0x3a0] sm:$0xff]  ;;  %v164_v45 = vld [vmem:[%s3234_s0 + $0x3a8] sm:$0xff] }
  0x25   :  { %2163 = vmatmul.msk.f32.vlgmr.msra.gmra.mxu1 %vm213_vm1, %v2379_v21  ;;  %2165 = vmatmul.msk.f32.vlgmr.msra.gmra.mxu2 %vm213_vm1, %v2379_v21  ;;  %v165_v46 = vld [vmem:[%s3234_s0 + $0x3b0] sm:$0xff]  ;;  %v166_v47 = vld [vmem:[%s3234_s0 + $0x3b8] sm:$0xff]  ;;  %v131_v48 = vld [vmem:[%s3234_s0 + $0x2a0] sm:$0xff] }
  0x26   :  { %2167 = vmatmul.msk.f32.vlgmr.msra.gmra.mxu3 %vm213_vm1, %v2379_v21  ;;  %2168 = vmatpush.msk.msrb.mxu0 %vm217_vm0, %v187_v63  ;;  %v132_v49 = vld [vmem:[%s3234_s0 + $0x2a8] sm:$0xff]  ;;  %v133_v50 = vld [vmem:[%s3234_s0 + $0x2b0] sm:$0xff]  ;;  %v134_v51 = vld [vmem:[%s3234_s0 + $0x2b8] sm:$0xff] }
  0x27   :  { %2170 = vmatpush.msk.msrb.mxu1 %vm217_vm0, %v188_v0  ;;  %2172 = vmatpush.msk.msrb.mxu2 %vm217_vm0, %v189_v1  ;;  %v99_v52 = vld [vmem:[%s3234_s0 + $0x1a0] sm:$0xff]  ;;  %v100_v53 = vld [vmem:[%s3234_s0 + $0x1a8] sm:$0xff]  ;;  %v101_v54 = vld [vmem:[%s3234_s0 + $0x1b0] sm:$0xff] }
  0x28   :  { %2174 = vmatpush.msk.msrb.mxu3 %vm217_vm0, %v190_v2  ;;  %566 = vmatpush.msrb.mxu0 %v155_v3  ;;  %v102_v55 = vld [vmem:[%s3234_s0 + $0x1b8] sm:$0xff]  ;;  %v67_v56 = vld [vmem:[%s3234_s0 + $0xa0] sm:$0xff]  ;;  %v68_v57 = vld [vmem:[%s3234_s0 + $0xa8] sm:$0xff] }
  0x29   :  { %586 = vmatpush.msrb.mxu1 %v156_v4  ;;  %606 = vmatpush.msrb.mxu2 %v157_v5  ;;  %v69_v58 = vld [vmem:[%s3234_s0 + $0xb0] sm:$0xff]  ;;  %v70_v59 = vld [vmem:[%s3234_s0 + $0xb8] sm:$0xff]  ;;  %v199_v60 = vld [vmem:[%s3234_s0 + $0x4c0] sm:$0xf] }
  0x2a   :  { %626 = vmatpush.msrb.mxu3 %v158_v6  ;;  %567 = vmatpush.msrb.mxu0 %v123_v7  ;;  %v200_v61 = vld [vmem:[%s3234_s0 + $0x4c8] sm:$0xf]  ;;  %v201_v62 = vld [vmem:[%s3234_s0 + $0x4d0] sm:$0xf]  ;;  %v202_v63 = vld [vmem:[%s3234_s0 + $0x4d8] sm:$0xf] }
  0x2b   :  { %587 = vmatpush.msrb.mxu1 %v124_v8  ;;  %607 = vmatpush.msrb.mxu2 %v125_v9  ;;  %v167_v0 = vld [vmem:[%s3234_s0 + $0x3c0] sm:$0xff]  ;;  %v168_v1 = vld [vmem:[%s3234_s0 + $0x3c8] sm:$0xff]  ;;  %v169_v2 = vld [vmem:[%s3234_s0 + $0x3d0] sm:$0xff] }
  0x2c   :  { %627 = vmatpush.msrb.mxu3 %v126_v10  ;;  %568 = vmatpush.msrb.mxu0 %v91_v11  ;;  %v170_v3 = vld [vmem:[%s3234_s0 + $0x3d8] sm:$0xff]  ;;  %v135_v4 = vld [vmem:[%s3234_s0 + $0x2c0] sm:$0xff]  ;;  %v136_v5 = vld [vmem:[%s3234_s0 + $0x2c8] sm:$0xff] }
  0x2d   :  { %588 = vmatpush.msrb.mxu1 %v92_v12  ;;  %608 = vmatpush.msrb.mxu2 %v93_v13  ;;  %v137_v6 = vld [vmem:[%s3234_s0 + $0x2d0] sm:$0xff]  ;;  %v138_v7 = vld [vmem:[%s3234_s0 + $0x2d8] sm:$0xff]  ;;  %v103_v8 = vld [vmem:[%s3234_s0 + $0x1c0] sm:$0xff] }
  0x2e   :  { %628 = vmatpush.msrb.mxu3 %v94_v14  ;;  %569 = vmatpush.msrb.mxu0 %v59_v15  ;;  %v104_v9 = vld [vmem:[%s3234_s0 + $0x1c8] sm:$0xff]  ;;  %v105_v10 = vld [vmem:[%s3234_s0 + $0x1d0] sm:$0xff]  ;;  %v106_v11 = vld [vmem:[%s3234_s0 + $0x1d8] sm:$0xff] }
  0x2f   :  { %589 = vmatpush.msrb.mxu1 %v60_v16  ;;  %609 = vmatpush.msrb.mxu2 %v61_v17  ;;  %v71_v12 = vld [vmem:[%s3234_s0 + $0xc0] sm:$0xff]  ;;  %v72_v13 = vld [vmem:[%s3234_s0 + $0xc8] sm:$0xff]  ;;  %v73_v14 = vld [vmem:[%s3234_s0 + $0xd0] sm:$0xff] }
  0x30   :  { %629 = vmatpush.msrb.mxu3 %v62_v18  ;;  %2169 = vmatmul.msk.f32.vlgmr.msrb.gmra.mxu0 %vm213_vm1, %v2379_v21  ;;  %v74_v15 = vld [vmem:[%s3234_s0 + $0xd8] sm:$0xff]  ;;  %v203_v16 = vld [vmem:[%s3234_s0 + $0x4e0] sm:$0xf]  ;;  %v204_v17 = vld [vmem:[%s3234_s0 + $0x4e8] sm:$0xf] }
  0x31   :  { %2171 = vmatmul.msk.f32.vlgmr.msrb.gmra.mxu1 %vm213_vm1, %v2379_v21  ;;  %2173 = vmatmul.msk.f32.vlgmr.msrb.gmra.mxu2 %vm213_vm1, %v2379_v21  ;;  %v205_v18 = vld [vmem:[%s3234_s0 + $0x4f0] sm:$0xf] }
  0x32   :  { %2175 = vmatmul.msk.f32.vlgmr.msrb.gmra.mxu3 %vm213_vm1, %v2379_v21  ;;  %2176 = vmatpush.msk.msra.mxu0 %vm217_vm0, %v191_v19  ;;  %v206_v19 = vld [vmem:[%s3234_s0 + $0x4f8] sm:$0xf] }
  0x33   :  { %2178 = vmatpush.msk.msra.mxu1 %vm217_vm0, %v192_v20  ;;  %2180 = vmatpush.msk.msra.mxu2 %vm217_vm0, %v193_v22  ;;  %v171_v20 = vld [vmem:[%s3234_s0 + $0x3e0] sm:$0xff]  ;;  %v172_v22 = vld [vmem:[%s3234_s0 + $0x3e8] sm:$0xff] }
  0x34   :  { %2182 = vmatpush.msk.msra.mxu3 %vm217_vm0, %v194_v23  ;;  %646 = vmatpush.msra.mxu0 %v159_v24  ;;  %v173_v23 = vld [vmem:[%s3234_s0 + $0x3f0] sm:$0xff]  ;;  %v174_v24 = vld [vmem:[%s3234_s0 + $0x3f8] sm:$0xff] }
  0x35   :  { %666 = vmatpush.msra.mxu1 %v160_v25  ;;  %686 = vmatpush.msra.mxu2 %v161_v26  ;;  %v139_v25 = vld [vmem:[%s3234_s0 + $0x2e0] sm:$0xff]  ;;  %v140_v26 = vld [vmem:[%s3234_s0 + $0x2e8] sm:$0xff] }
  0x36   :  { %706 = vmatpush.msra.mxu3 %v162_v27  ;;  %647 = vmatpush.msra.mxu0 %v127_v28  ;;  %v141_v27 = vld [vmem:[%s3234_s0 + $0x2f0] sm:$0xff]  ;;  %v142_v28 = vld [vmem:[%s3234_s0 + $0x2f8] sm:$0xff] }
  0x37   :  { %667 = vmatpush.msra.mxu1 %v128_v29  ;;  %687 = vmatpush.msra.mxu2 %v129_v30  ;;  %v107_v29 = vld [vmem:[%s3234_s0 + $0x1e0] sm:$0xff]  ;;  %v108_v30 = vld [vmem:[%s3234_s0 + $0x1e8] sm:$0xff] }
  0x38   :  { %707 = vmatpush.msra.mxu3 %v130_v31  ;;  %648 = vmatpush.msra.mxu0 %v95_v32  ;;  %v109_v31 = vld [vmem:[%s3234_s0 + $0x1f0] sm:$0xff]  ;;  %v110_v32 = vld [vmem:[%s3234_s0 + $0x1f8] sm:$0xff] }
  0x39   :  { %668 = vmatpush.msra.mxu1 %v96_v33  ;;  %688 = vmatpush.msra.mxu2 %v97_v34  ;;  %v75_v33 = vld [vmem:[%s3234_s0 + $0xe0] sm:$0xff]  ;;  %v76_v34 = vld [vmem:[%s3234_s0 + $0xe8] sm:$0xff] }
  0x3a   :  { %708 = vmatpush.msra.mxu3 %v98_v35  ;;  %649 = vmatpush.msra.mxu0 %v63_v36  ;;  %v77_v35 = vld [vmem:[%s3234_s0 + $0xf0] sm:$0xff]  ;;  %v78_v36 = vld [vmem:[%s3234_s0 + $0xf8] sm:$0xff] }
  0x3b   :  { %669 = vmatpush.msra.mxu1 %v64_v37  ;;  %689 = vmatpush.msra.mxu2 %v65_v38 }
  0x3c   :  { %709 = vmatpush.msra.mxu3 %v66_v39  ;;  %2177 = vmatmul.msk.f32.vlgmr.msra.gmra.mxu0 %vm213_vm1, %v2379_v21 }
  0x3d   :  { %2179 = vmatmul.msk.f32.vlgmr.msra.gmra.mxu1 %vm213_vm1, %v2379_v21  ;;  %2181 = vmatmul.msk.f32.vlgmr.msra.gmra.mxu2 %vm213_vm1, %v2379_v21 }
  0x3e   :  { %2183 = vmatmul.msk.f32.vlgmr.msra.gmra.mxu3 %vm213_vm1, %v2379_v21  ;;  %2184 = vmatpush.msk.msrb.mxu0 %vm217_vm0, %v195_v40 }
  0x3f   :  { %2186 = vmatpush.msk.msrb.mxu1 %vm217_vm0, %v196_v41  ;;  %2188 = vmatpush.msk.msrb.mxu2 %vm217_vm0, %v197_v42 }
  0x40   :  { %2190 = vmatpush.msk.msrb.mxu3 %vm217_vm0, %v198_v43  ;;  %726 = vmatpush.msrb.mxu0 %v163_v44 }
  0x41   :  { %746 = vmatpush.msrb.mxu1 %v164_v45  ;;  %766 = vmatpush.msrb.mxu2 %v165_v46 }
  0x42   :  { %786 = vmatpush.msrb.mxu3 %v166_v47  ;;  %727 = vmatpush.msrb.mxu0 %v131_v48 }
  0x43   :  { %747 = vmatpush.msrb.mxu1 %v132_v49  ;;  %767 = vmatpush.msrb.mxu2 %v133_v50  ;;  %v1018_v49 = vld [vmem:[%s3237_s1 + $0x100] sm:$0xff] }
  0x44   :  { %787 = vmatpush.msrb.mxu3 %v134_v51  ;;  %728 = vmatpush.msrb.mxu0 %v99_v52  ;;  %v986_v50 = vld [vmem:[%s3237_s1] sm:$0xff]  ;;  %v1019_v51 = vld [vmem:[%s3237_s1 + $0x108] sm:$0xff] }
  0x45   :  { %748 = vmatpush.msrb.mxu1 %v100_v53  ;;  %768 = vmatpush.msrb.mxu2 %v101_v54  ;;  %v987_v52 = vld [vmem:[%s3237_s1 + $0x8] sm:$0xff] }
  0x46   :  { %788 = vmatpush.msrb.mxu3 %v102_v55  ;;  %729 = vmatpush.msrb.mxu0 %v67_v56 }
  0x47   :  { %749 = vmatpush.msrb.mxu1 %v68_v57  ;;  %769 = vmatpush.msrb.mxu2 %v69_v58 }
  0x48   :  { %789 = vmatpush.msrb.mxu3 %v70_v59  ;;  %2185 = vmatmul.msk.f32.vlgmr.msrb.gmra.mxu0 %vm213_vm1, %v2379_v21  ;;  %v988_v59 = vld [vmem:[%s3237_s1 + $0x10] sm:$0xff] }
  0x49   :  { %2187 = vmatmul.msk.f32.vlgmr.msrb.gmra.mxu1 %vm213_vm1, %v2379_v21  ;;  %2189 = vmatmul.msk.f32.vlgmr.msrb.gmra.mxu2 %vm213_vm1, %v2379_v21 }
  0x4a   :  { %2191 = vmatmul.msk.f32.vlgmr.msrb.gmra.mxu3 %vm213_vm1, %v2379_v21  ;;  %2192 = vmatpush.msk.msra.mxu0 %vm217_vm0, %v199_v60  ;;  %v990_v60 = vld [vmem:[%s3237_s1 + $0x20] sm:$0xff] }
  0x4b   :  { %2194 = vmatpush.msk.msra.mxu1 %vm217_vm0, %v200_v61  ;;  %2196 = vmatpush.msk.msra.mxu2 %vm217_vm0, %v201_v62 }
  0x4c   :  { %2198 = vmatpush.msk.msra.mxu3 %vm217_vm0, %v202_v63  ;;  %806 = vmatpush.msra.mxu0 %v167_v0  ;;  %v989_v63 = vld [vmem:[%s3237_s1 + $0x18] sm:$0xff]  ;;  %v991_v0 = vld [vmem:[%s3237_s1 + $0x28] sm:$0xff] }
  0x4d   :  { %826 = vmatpush.msra.mxu1 %v168_v1  ;;  %846 = vmatpush.msra.mxu2 %v169_v2 }
  0x4e   :  { %866 = vmatpush.msra.mxu3 %v170_v3  ;;  %807 = vmatpush.msra.mxu0 %v135_v4 }
  0x4f   :  { %827 = vmatpush.msra.mxu1 %v136_v5  ;;  %847 = vmatpush.msra.mxu2 %v137_v6 }
  0x50   :  { %867 = vmatpush.msra.mxu3 %v138_v7  ;;  %808 = vmatpush.msra.mxu0 %v103_v8 }
  0x51   :  { %828 = vmatpush.msra.mxu1 %v104_v9  ;;  %848 = vmatpush.msra.mxu2 %v105_v10  ;;  %v1020_v9 = vld [vmem:[%s3237_s1 + $0x110] sm:$0xff] }
  0x52   :  { %868 = vmatpush.msra.mxu3 %v106_v11  ;;  %809 = vmatpush.msra.mxu0 %v71_v12  ;;  %v1021_v11 = vld [vmem:[%s3237_s1 + $0x118] sm:$0xff] }
  0x53   :  { %829 = vmatpush.msra.mxu1 %v72_v13  ;;  %849 = vmatpush.msra.mxu2 %v73_v14  ;;  %v1022_v13 = vld [vmem:[%s3237_s1 + $0x120] sm:$0xff]  ;;  %v1023_v14 = vld [vmem:[%s3237_s1 + $0x128] sm:$0xff] }
  0x54   :  { %869 = vmatpush.msra.mxu3 %v74_v15  ;;  %2193 = vmatmul.msk.f32.vlgmr.msra.gmra.mxu0 %vm213_vm1, %v2379_v21 }
  0x55   :  { %2195 = vmatmul.msk.f32.vlgmr.msra.gmra.mxu1 %vm213_vm1, %v2379_v21  ;;  %2197 = vmatmul.msk.f32.vlgmr.msra.gmra.mxu2 %vm213_vm1, %v2379_v21 }
  0x56   :  { %2199 = vmatmul.msk.f32.vlgmr.msra.gmra.mxu3 %vm213_vm1, %v2379_v21  ;;  %2200 = vmatpush.msk.msrb.mxu0 %vm217_vm0, %v203_v16 }
  0x57   :  { %2202 = vmatpush.msk.msrb.mxu1 %vm217_vm0, %v204_v17  ;;  %2204 = vmatpush.msk.msrb.mxu2 %vm217_vm0, %v205_v18 }
  0x58   :  { %2206 = vmatpush.msk.msrb.mxu3 %vm217_vm0, %v206_v19  ;;  %886 = vmatpush.msrb.mxu0 %v171_v20  ;;  %v992_v20 = vld [vmem:[%s3237_s1 + $0x30] sm:$0xff] }
  0x59   :  { %906 = vmatpush.msrb.mxu1 %v172_v22  ;;  %926 = vmatpush.msrb.mxu2 %v173_v23  ;;  %v993_v23 = vld [vmem:[%s3237_s1 + $0x38] sm:$0xff] }
  0x5a   :  { %946 = vmatpush.msrb.mxu3 %v174_v24  ;;  %887 = vmatpush.msrb.mxu0 %v139_v25  ;;  %v994_v25 = vld [vmem:[%s3237_s1 + $0x40] sm:$0xff] }
  0x5b   :  { %907 = vmatpush.msrb.mxu1 %v140_v26  ;;  %927 = vmatpush.msrb.mxu2 %v141_v27  ;;  %v995_v26 = vld [vmem:[%s3237_s1 + $0x48] sm:$0xff] }
  0x5c   :  { %947 = vmatpush.msrb.mxu3 %v142_v28  ;;  %888 = vmatpush.msrb.mxu0 %v107_v29 }
  0x5d   :  { %908 = vmatpush.msrb.mxu1 %v108_v30  ;;  %928 = vmatpush.msrb.mxu2 %v109_v31 }
  0x5e   :  { %948 = vmatpush.msrb.mxu3 %v110_v32  ;;  %889 = vmatpush.msrb.mxu0 %v75_v33  ;;  %v1024_v32 = vld [vmem:[%s3237_s1 + $0x130] sm:$0xff] }
  0x5f   :  { %909 = vmatpush.msrb.mxu1 %v76_v34  ;;  %929 = vmatpush.msrb.mxu2 %v77_v35  ;;  %v1025_v34 = vld [vmem:[%s3237_s1 + $0x138] sm:$0xff] }
  0x60   :  { %949 = vmatpush.msrb.mxu3 %v78_v36  ;;  %2201 = vmatmul.msk.f32.vlgmr.msrb.gmra.mxu0 %vm213_vm1, %v2379_v21 }
  0x61   :  { %2203 = vmatmul.msk.f32.vlgmr.msrb.gmra.mxu1 %vm213_vm1, %v2379_v21  ;;  %2205 = vmatmul.msk.f32.vlgmr.msrb.gmra.mxu2 %vm213_vm1, %v2379_v21 }
  0x62   :  { %2207 = vmatmul.msk.f32.vlgmr.msrb.gmra.mxu3 %vm213_vm1, %v2379_v21 }
  0x89   :  { %v331_v37 = vpop.f32.mrf.mxu0  ;;  %v351_v38 = vpop.f32.mrf.mxu1 }
  0x8e   :  { %v2896_v39 = vpop.permute.xlu0 %210 }
  0x8f   :  { %v332_v40 = vadd.f32 %v331_v37, %v2896_v39  ;;  %v352_v41 = vadd.f32 %v351_v38, %v2896_v39  ;;  %v1026_v37 = vld [vmem:[%s3237_s1 + $0x140] sm:$0xff]  ;;  %v1027_v38 = vld [vmem:[%s3237_s1 + $0x148] sm:$0xff] }
  0x90   :  { %v371_v42 = vpop.f32.mrf.mxu2  ;;  %v391_v43 = vpop.f32.mrf.mxu3 }
  0x91   :  { %v954_v44 = vmax.f32 %v332_v40, 0.0  ;;  %v955_v45 = vmax.f32 %v352_v41, 0.0  ;;  %v372_v46 = vadd.f32 %v371_v42, %v2896_v39  ;;  %v392_v47 = vadd.f32 %v391_v43, %v2896_v39 }
  0x93   :  { %1065 = vmatpush.xpose.msra.mxu0 %v954_v44  ;;  %2226 = vmatpush.xpose.msra.mxu2 %v954_v44  ;;  %v956_v48 = vmax.f32 %v372_v46, 0.0  ;;  %v957_v21 = vmax.f32 %v392_v47, 0.0  ;;  %v996_v47 = vld [vmem:[%s3237_s1 + $0x50] sm:$0xff] }
  0x94   :  { %1088 = vmatpush.xpose.msra.mxu1 %v955_v45  ;;  %2227 = vmatpush.xpose.msra.mxu3 %v955_v45 }
  0x95   :  { %v411_v53 = vpop.f32.mrf.mxu0  ;;  %v431_v54 = vpop.f32.mrf.mxu1 }
  0x96   :  { %1069 = vmatmul.f32.vlgmr.msra.gmra.mxu2 %v1018_v49  ;;  %v412_v55 = vadd.f32 %v411_v53, %v2896_v39  ;;  %v432_v56 = vadd.f32 %v431_v54, %v2896_v39  ;;  %1066 = vmatmul.f32.vlgmr.msra.gmra.mxu0 %v986_v50  ;;  %v998_v50 = vld [vmem:[%s3237_s1 + $0x60] sm:$0xff] }
  0x97   :  { %1111 = vmatpush.xpose.msrb.mxu2 %v956_v48  ;;  %1092 = vmatmul.f32.vlgmr.msra.gmra.mxu3 %v1019_v51  ;;  %v999_v51 = vld [vmem:[%s3237_s1 + $0x68] sm:$0xff] }
  0x98   :  { %1134 = vmatpush.xpose.msrb.mxu3 %v957_v21  ;;  %1089 = vmatmul.f32.vlgmr.msra.gmra.mxu1 %v987_v52  ;;  %v958_v57 = vmax.f32 %v412_v55, 0.0  ;;  %v959_v58 = vmax.f32 %v432_v56, 0.0  ;;  %v997_v21 = vld [vmem:[%s3237_s1 + $0x58] sm:$0xff] }
  0x9a   :  { %1157 = vmatpush.xpose.msrb.mxu0 %v958_v57  ;;  %1180 = vmatpush.xpose.msrb.mxu1 %v959_v58  ;;  %v1028_v57 = vld [vmem:[%s3237_s1 + $0x150] sm:$0xff] }
  0x9c   :  { %v451_v61 = vpop.f32.mrf.mxu2  ;;  %v471_v62 = vpop.f32.mrf.mxu3 }
  0x9d   :  { %v452_v1 = vadd.f32 %v451_v61, %v2896_v39  ;;  %v472_v2 = vadd.f32 %v471_v62, %v2896_v39  ;;  %v1030_v61 = vld [vmem:[%s3237_s1 + $0x160] sm:$0xff]  ;;  %v1031_v62 = vld [vmem:[%s3237_s1 + $0x168] sm:$0xff] }
  0x9e   :  { %1112 = vmatmul.f32.vlgmr.msrb.gmra.mxu2 %v988_v59  ;;  %1158 = vmatmul.f32.vlgmr.msrb.gmra.mxu0 %v990_v60  ;;  %v1029_v59 = vld [vmem:[%s3237_s1 + $0x158] sm:$0xff] }
  0x9f   :  { %v960_v3 = vmax.f32 %v452_v1, 0.0  ;;  %v961_v4 = vmax.f32 %v472_v2, 0.0  ;;  %1135 = vmatmul.f32.vlgmr.msrb.gmra.mxu3 %v989_v63 }
  0xa0   :  { %1181 = vmatmul.f32.vlgmr.msrb.gmra.mxu1 %v991_v0 }
  0xa1   :  { %v491_v5 = vpop.f32.mrf.mxu0  ;;  %1203 = vmatpush.xpose.msra.mxu2 %v960_v3  ;;  %1226 = vmatpush.xpose.msra.mxu3 %v961_v4  ;;  %v1000_v4 = vld [vmem:[%s3237_s1 + $0x70] sm:$0xff] }
  0xa2   :  { %v492_v6 = vadd.f32 %v491_v5, %v2896_v39  ;;  %v511_v7 = vpop.f32.mrf.mxu1 }
  0xa3   :  { %v512_v8 = vadd.f32 %v511_v7, %v2896_v39 }
  0xa4   :  { %v962_v10 = vmax.f32 %v492_v6, 0.0  ;;  %v1001_v6 = vld [vmem:[%s3237_s1 + $0x78] sm:$0xff] }
  0xa5   :  { %v963_v12 = vmax.f32 %v512_v8, 0.0 }
  0xa6   :  { %1249 = vmatpush.xpose.msra.mxu0 %v962_v10  ;;  %1115 = vmatmul.f32.gmra.mxu2 %v1020_v9  ;;  %v1002_v9 = vld [vmem:[%s3237_s1 + $0x80] sm:$0xff]  ;;  %v1003_v10 = vld [vmem:[%s3237_s1 + $0x88] sm:$0xff] }
  0xa7   :  { %1272 = vmatpush.xpose.msra.mxu1 %v963_v12  ;;  %1138 = vmatmul.f32.gmra.mxu3 %v1021_v11 }
  0xa8   :  { %v531_v15 = vpop.f32.mrf.mxu2  ;;  %1161 = vmatmul.f32.gmra.mxu0 %v1022_v13  ;;  %1184 = vmatmul.f32.gmra.mxu1 %v1023_v14 }
  0xa9   :  { %v532_v16 = vadd.f32 %v531_v15, %v2896_v39  ;;  %v551_v17 = vpop.f32.mrf.mxu3 }
  0xaa   :  { %v552_v18 = vadd.f32 %v551_v17, %v2896_v39 }
  0xab   :  { %v964_v19 = vmax.f32 %v532_v16, 0.0 }
  0xac   :  { %v965_v22 = vmax.f32 %v552_v18, 0.0  ;;  %v1032_v18 = vld [vmem:[%s3237_s1 + $0x170] sm:$0xff] }
  0xad   :  { %v571_v24 = vpop.f32.mrf.mxu0  ;;  %1295 = vmatpush.xpose.msrb.mxu2 %v964_v19 }
  0xae   :  { %v572_v27 = vadd.f32 %v571_v24, %v2896_v39  ;;  %v591_v28 = vpop.f32.mrf.mxu1  ;;  %1318 = vmatpush.xpose.msrb.mxu3 %v965_v22  ;;  %1204 = vmatmul.f32.vlgmr.msra.gmra.mxu2 %v992_v20  ;;  %v1033_v20 = vld [vmem:[%s3237_s1 + $0x178] sm:$0xff]  ;;  %v1035_v24 = vld [vmem:[%s3237_s1 + $0x188] sm:$0xff] }
  0xaf   :  { %v592_v29 = vadd.f32 %v591_v28, %v2896_v39  ;;  %1227 = vmatmul.f32.vlgmr.msra.gmra.mxu3 %v993_v23  ;;  %v1034_v23 = vld [vmem:[%s3237_s1 + $0x180] sm:$0xff] }
  0xb0   :  { %v966_v30 = vmax.f32 %v572_v27, 0.0  ;;  %1250 = vmatmul.f32.vlgmr.msra.gmra.mxu0 %v994_v25  ;;  %1273 = vmatmul.f32.vlgmr.msra.gmra.mxu1 %v995_v26 }
  0xb1   :  { %v967_v31 = vmax.f32 %v592_v29, 0.0  ;;  %v1004_v29 = vld [vmem:[%s3237_s1 + $0x90] sm:$0xff] }
  0xb2   :  { %1341 = vmatpush.xpose.msrb.mxu0 %v966_v30  ;;  %v1005_v30 = vld [vmem:[%s3237_s1 + $0x98] sm:$0xff] }
  0xb3   :  { %1364 = vmatpush.xpose.msrb.mxu1 %v967_v31 }
  0xb4   :  { %v611_v33 = vpop.f32.mrf.mxu2 }
  0xb5   :  { %v612_v35 = vadd.f32 %v611_v33, %v2896_v39  ;;  %v631_v36 = vpop.f32.mrf.mxu3  ;;  %v1006_v33 = vld [vmem:[%s3237_s1 + $0xa0] sm:$0xff] }
  0xb6   :  { %v632_v40 = vadd.f32 %v631_v36, %v2896_v39  ;;  %1207 = vmatmul.f32.gmra.mxu2 %v1024_v32 }
  0xb7   :  { %v968_v41 = vmax.f32 %v612_v35, 0.0  ;;  %1230 = vmatmul.f32.gmra.mxu3 %v1025_v34 }
  0xb8   :  { %v969_v42 = vmax.f32 %v632_v40, 0.0  ;;  %1253 = vmatmul.f32.gmra.mxu0 %v1026_v37  ;;  %1276 = vmatmul.f32.gmra.mxu1 %v1027_v38  ;;  %v1007_v37 = vld [vmem:[%s3237_s1 + $0xa8] sm:$0xff] }
  0xb9   :  { %v651_v43 = vpop.f32.mrf.mxu0  ;;  %1387 = vmatpush.xpose.msra.mxu2 %v968_v41 }
  0xba   :  { %v652_v44 = vadd.f32 %v651_v43, %v2896_v39  ;;  %v671_v45 = vpop.f32.mrf.mxu1  ;;  %1410 = vmatpush.xpose.msra.mxu3 %v969_v42  ;;  %v1036_v42 = vld [vmem:[%s3237_s1 + $0x190] sm:$0xff]  ;;  %v1037_v43 = vld [vmem:[%s3237_s1 + $0x198] sm:$0xff] }
  0xbb   :  { %v672_v46 = vadd.f32 %v671_v45, %v2896_v39 }
  0xbc   :  { %v970_v48 = vmax.f32 %v652_v44, 0.0  ;;  %v1038_v44 = vld [vmem:[%s3237_s1 + $0x1a0] sm:$0xff] }
  0xbd   :  { %v971_v49 = vmax.f32 %v672_v46, 0.0  ;;  %v1039_v46 = vld [vmem:[%s3237_s1 + $0x1a8] sm:$0xff] }
  0xbe   :  { %1433 = vmatpush.xpose.msra.mxu0 %v970_v48  ;;  %1296 = vmatmul.f32.vlgmr.msrb.gmra.mxu2 %v996_v47 }
  0xbf   :  { %1456 = vmatpush.xpose.msra.mxu1 %v971_v49  ;;  %1319 = vmatmul.f32.vlgmr.msrb.gmra.mxu3 %v997_v21  ;;  %v1008_v49 = vld [vmem:[%s3237_s1 + $0xb0] sm:$0xff] }
  0xc0   :  { %v691_v52 = vpop.f32.mrf.mxu2  ;;  %1342 = vmatmul.f32.vlgmr.msrb.gmra.mxu0 %v998_v50  ;;  %1365 = vmatmul.f32.vlgmr.msrb.gmra.mxu1 %v999_v51  ;;  %v1009_v50 = vld [vmem:[%s3237_s1 + $0xb8] sm:$0xff] }
  0xc1   :  { %v692_v53 = vadd.f32 %v691_v52, %v2896_v39  ;;  %v711_v54 = vpop.f32.mrf.mxu3  ;;  %v1010_v52 = vld [vmem:[%s3237_s1 + $0xc0] sm:$0xff] }
  0xc2   :  { %v712_v55 = vadd.f32 %v711_v54, %v2896_v39  ;;  %v1011_v54 = vld [vmem:[%s3237_s1 + $0xc8] sm:$0xff] }
  0xc3   :  { %v972_v56 = vmax.f32 %v692_v53, 0.0 }
  0xc4   :  { %v973_v58 = vmax.f32 %v712_v55, 0.0  ;;  %v1041_v55 = vld [vmem:[%s3237_s1 + $0x1b8] sm:$0xff] }
  0xc5   :  { %v731_v60 = vpop.f32.mrf.mxu0  ;;  %1479 = vmatpush.xpose.msrb.mxu2 %v972_v56  ;;  %v1042_v56 = vld [vmem:[%s3237_s1 + $0x1c0] sm:$0xff] }
  0xc6   :  { %v732_v63 = vadd.f32 %v731_v60, %v2896_v39  ;;  %v751_v0 = vpop.f32.mrf.mxu1  ;;  %1502 = vmatpush.xpose.msrb.mxu3 %v973_v58  ;;  %1299 = vmatmul.f32.gmra.mxu2 %v1028_v57  ;;  %v1043_v57 = vld [vmem:[%s3237_s1 + $0x1c8] sm:$0xff]  ;;  %v1012_v58 = vld [vmem:[%s3237_s1 + $0xd0] sm:$0xff]  ;;  %v1014_v60 = vld [vmem:[%s3237_s1 + $0xe0] sm:$0xff] }
  0xc7   :  { %v752_v1 = vadd.f32 %v751_v0, %v2896_v39  ;;  %1322 = vmatmul.f32.gmra.mxu3 %v1029_v59  ;;  %v1013_v59 = vld [vmem:[%s3237_s1 + $0xd8] sm:$0xff]  ;;  %v1046_v0 = vld [vmem:[%s3237_s1 + $0x1e0] sm:$0xff] }
  0xc8   :  { %v974_v2 = vmax.f32 %v732_v63, 0.0  ;;  %1345 = vmatmul.f32.gmra.mxu0 %v1030_v61  ;;  %1368 = vmatmul.f32.gmra.mxu1 %v1031_v62  ;;  %v1015_v61 = vld [vmem:[%s3237_s1 + $0xe8] sm:$0xff]  ;;  %v1044_v62 = vld [vmem:[%s3237_s1 + $0x1d0] sm:$0xff]  ;;  %v1045_v63 = vld [vmem:[%s3237_s1 + $0x1d8] sm:$0xff] }
  0xc9   :  { %v975_v3 = vmax.f32 %v752_v1, 0.0  ;;  %v1047_v1 = vld [vmem:[%s3237_s1 + $0x1e8] sm:$0xff] }
  0xca   :  { %1525 = vmatpush.xpose.msrb.mxu0 %v974_v2  ;;  %v1016_v2 = vld [vmem:[%s3237_s1 + $0xf0] sm:$0xff] }
  0xcb   :  { %1548 = vmatpush.xpose.msrb.mxu1 %v975_v3  ;;  %v1017_v3 = vld [vmem:[%s3237_s1 + $0xf8] sm:$0xff] }
  0xcc   :  { %v771_v5 = vpop.f32.mrf.mxu2 }
  0xcd   :  { %v772_v7 = vadd.f32 %v771_v5, %v2896_v39  ;;  %v791_v8 = vpop.f32.mrf.mxu3 }
  0xce   :  { %v792_v11 = vadd.f32 %v791_v8, %v2896_v39  ;;  %1388 = vmatmul.f32.vlgmr.msra.gmra.mxu2 %v1000_v4  ;;  %v1048_v4 = vld [vmem:[%s3237_s1 + $0x1f0] sm:$0xff] }
  0xcf   :  { %v976_v12 = vmax.f32 %v772_v7, 0.0  ;;  %1411 = vmatmul.f32.vlgmr.msra.gmra.mxu3 %v1001_v6  ;;  %v1049_v6 = vld [vmem:[%s3237_s1 + $0x1f8] sm:$0xff] }
  0xd0   :  { %v977_v13 = vmax.f32 %v792_v11, 0.0  ;;  %1434 = vmatmul.f32.vlgmr.msra.gmra.mxu0 %v1002_v9  ;;  %1457 = vmatmul.f32.vlgmr.msra.gmra.mxu1 %v1003_v10 }
  0xd1   :  { %v811_v14 = vpop.f32.mrf.mxu0  ;;  %1571 = vmatpush.xpose.msra.mxu2 %v976_v12 }
  0xd2   :  { %v812_v15 = vadd.f32 %v811_v14, %v2896_v39  ;;  %v831_v16 = vpop.f32.mrf.mxu1  ;;  %1594 = vmatpush.xpose.msra.mxu3 %v977_v13 }
  0xd3   :  { %v832_v17 = vadd.f32 %v831_v16, %v2896_v39 }
  0xd4   :  { %v978_v19 = vmax.f32 %v812_v15, 0.0 }
  0xd5   :  { %v979_v22 = vmax.f32 %v832_v17, 0.0 }
  0xd6   :  { %1617 = vmatpush.xpose.msra.mxu0 %v978_v19  ;;  %1391 = vmatmul.f32.gmra.mxu2 %v1032_v18 }
  0xd7   :  { %1640 = vmatpush.xpose.msra.mxu1 %v979_v22  ;;  %1414 = vmatmul.f32.gmra.mxu3 %v1033_v20 }
  0xd8   :  { %v851_v25 = vpop.f32.mrf.mxu2  ;;  %1437 = vmatmul.f32.gmra.mxu0 %v1034_v23  ;;  %1460 = vmatmul.f32.gmra.mxu1 %v1035_v24 }
  0xd9   :  { %v852_v26 = vadd.f32 %v851_v25, %v2896_v39  ;;  %v871_v27 = vpop.f32.mrf.mxu3 }
  0xda   :  { %v872_v28 = vadd.f32 %v871_v27, %v2896_v39 }
  0xdb   :  { %v980_v31 = vmax.f32 %v852_v26, 0.0 }
  0xdc   :  { %v981_v34 = vmax.f32 %v872_v28, 0.0 }
  0xdd   :  { %v891_v32 = vpop.f32.mrf.mxu0 }
  0xde   :  { %v892_v35 = vadd.f32 %v891_v32, %v2896_v39  ;;  %v911_v36 = vpop.f32.mrf.mxu1  ;;  %1480 = vmatmul.f32.vlgmr.msrb.gmra.mxu2 %v1004_v29 }
  0xdf   :  { %v912_v38 = vadd.f32 %v911_v36, %v2896_v39  ;;  %1503 = vmatmul.f32.vlgmr.msrb.gmra.mxu3 %v1005_v30  ;;  %1663 = vmatpush.xpose.msrb.mxu2 %v980_v31 }
  0xe0   :  { %v982_v40 = vmax.f32 %v892_v35, 0.0  ;;  %1686 = vmatpush.xpose.msrb.mxu3 %v981_v34  ;;  %1526 = vmatmul.f32.vlgmr.msrb.gmra.mxu0 %v1006_v33 }
  0xe1   :  { %v983_v41 = vmax.f32 %v912_v38, 0.0  ;;  %1549 = vmatmul.f32.vlgmr.msrb.gmra.mxu1 %v1007_v37 }
  0xe2   :  { %1709 = vmatpush.xpose.msrb.mxu0 %v982_v40 }
  0xe3   :  { %1732 = vmatpush.xpose.msrb.mxu1 %v983_v41 }
  0xe4   :  { %v931_v45 = vpop.f32.mrf.mxu2 }
  0xe5   :  { %v951_v47 = vpop.f32.mrf.mxu3  ;;  %v932_v48 = vadd.f32 %v931_v45, %v2896_v39 }
  0xe6   :  { %1483 = vmatmul.f32.gmra.mxu2 %v1036_v42  ;;  %v952_v21 = vadd.f32 %v951_v47, %v2896_v39  ;;  %v1040_v39 = vld [vmem:[%s3237_s1 + $0x1b0] sm:$0xff] }
  0xe7   :  { %1506 = vmatmul.f32.gmra.mxu3 %v1037_v43  ;;  %v984_v51 = vmax.f32 %v932_v48, 0.0 }
  0xe8   :  { %1529 = vmatmul.f32.gmra.mxu0 %v1038_v44  ;;  %v985_v53 = vmax.f32 %v952_v21, 0.0 }
  0xe9   :  { %1552 = vmatmul.f32.gmra.mxu1 %v1039_v46 }
  0xee   :  { %1572 = vmatmul.f32.vlgmr.msra.gmra.mxu2 %v1008_v49 }
  0xef   :  { %1595 = vmatmul.f32.vlgmr.msra.gmra.mxu3 %v1009_v50  ;;  %1755 = vmatpush.xpose.msra.mxu2 %v984_v51 }
  0xf0   :  { %1778 = vmatpush.xpose.msra.mxu3 %v985_v53  ;;  %1618 = vmatmul.f32.vlgmr.msra.gmra.mxu0 %v1010_v52 }
  0xf1   :  { %1641 = vmatmul.f32.vlgmr.msra.gmra.mxu1 %v1011_v54 }
  0xf6   :  { %1575 = vmatmul.f32.gmra.mxu2 %v1040_v39 }
  0xf7   :  { %1598 = vmatmul.f32.gmra.mxu3 %v1041_v55 }
  0xf8   :  { %1621 = vmatmul.f32.gmra.mxu0 %v1042_v56 }
  0xf9   :  { %1644 = vmatmul.f32.gmra.mxu1 %v1043_v57 }
  0xfe   :  { %1664 = vmatmul.f32.vlgmr.msrb.gmra.mxu2 %v1012_v58 }
  0xff   :  { %1687 = vmatmul.f32.vlgmr.msrb.gmra.mxu3 %v1013_v59 }
 0x100   :  { %1710 = vmatmul.f32.vlgmr.msrb.gmra.mxu0 %v1014_v60 }
 0x101   :  { %1733 = vmatmul.f32.vlgmr.msrb.gmra.mxu1 %v1015_v61 }
 0x106   :  { %1667 = vmatmul.f32.gmra.mxu2 %v1044_v62 }
 0x107   :  { %1690 = vmatmul.f32.gmra.mxu3 %v1045_v63 }
 0x108   :  { %1713 = vmatmul.f32.gmra.mxu0 %v1046_v0 }
 0x109   :  { %1736 = vmatmul.f32.gmra.mxu1 %v1047_v1 }
 0x10e   :  { %1756 = vmatmul.f32.vlgmr.msra.gmra.mxu2 %v1016_v2 }
 0x10f   :  { %1779 = vmatmul.f32.vlgmr.msra.gmra.mxu3 %v1017_v3 }
 0x113   :  { %v1067_v5 = vpop.f32.mrf.mxu0 }
 0x115   :  { %v1090_v7 = vpop.f32.mrf.mxu1 }
 0x116   :  { %1759 = vmatmul.f32.gmra.mxu2 %v1048_v4  ;;  %v1091_v19 = vadd.f32 %v1090_v7, %v1067_v5 }
 0x117   :  { %1782 = vmatmul.f32.gmra.mxu3 %v1049_v6 }
 0x119   :  { %v1070_v8 = vpop.f32.mrf.mxu2 }
 0x11a   :  { %v1093_v9 = vpop.f32.mrf.mxu3 }
 0x11b   :  { %v1094_v10 = vadd.f32 %v1093_v9, %v1070_v8  ;;  %v1159_v11 = vpop.f32.mrf.mxu0 }
 0x11d   :  { %v1182_v12 = vpop.f32.mrf.mxu1 }
 0x121   :  { %v1113_v13 = vpop.f32.mrf.mxu2 }
 0x122   :  { %v1136_v14 = vpop.f32.mrf.mxu3  ;;  %v1114_v23 = vadd.f32 %v1113_v13, %v1091_v19 }
 0x124   :  { %v1137_v26 = vadd.f32 %v1136_v14, %v1114_v23 }
 0x125   :  { %v1162_v15 = vpop.f32.mrf.mxu0  ;;  %v1185_v16 = vpop.f32.mrf.mxu1 }
 0x126   :  { %v1160_v29 = vadd.f32 %v1159_v11, %v1137_v26 }
 0x128   :  { %v1183_v33 = vadd.f32 %v1182_v12, %v1160_v29 }
 0x129   :  { %v1116_v17 = vpop.f32.mrf.mxu2 }
 0x12a   :  { %v1139_v18 = vpop.f32.mrf.mxu3  ;;  %v1117_v30 = vadd.f32 %v1116_v17, %v1094_v10 }
 0x12c   :  { %v1140_v34 = vadd.f32 %v1139_v18, %v1117_v30  ;;  %v1786_v30 = vld [vmem:[%s3239_s4] sm:$0xff] }
 0x12d   :  { %v1251_v20 = vpop.f32.mrf.mxu0  ;;  %v1274_v22 = vpop.f32.mrf.mxu1  ;;  %1813 = vmatpush.msra.mxu0 %v1786_v30 }
 0x12e   :  { %v1163_v38 = vadd.f32 %v1162_v15, %v1140_v34 }
 0x130   :  { %v1186_v43 = vadd.f32 %v1185_v16, %v1163_v38 }
 0x131   :  { %v1205_v24 = vpop.f32.mrf.mxu2 }
 0x132   :  { %v1228_v25 = vpop.f32.mrf.mxu3  ;;  %v1206_v37 = vadd.f32 %v1205_v24, %v1183_v33 }
 0x134   :  { %v1229_v41 = vadd.f32 %v1228_v25, %v1206_v37 }
 0x135   :  { %v1254_v27 = vpop.f32.mrf.mxu0  ;;  %v1277_v28 = vpop.f32.mrf.mxu1 }
 0x136   :  { %v1252_v46 = vadd.f32 %v1251_v20, %v1229_v41 }
 0x138   :  { %v1275_v21 = vadd.f32 %v1274_v22, %v1252_v46 }
 0x139   :  { %v1208_v31 = vpop.f32.mrf.mxu2 }
 0x13a   :  { %v1231_v32 = vpop.f32.mrf.mxu3  ;;  %v1209_v47 = vadd.f32 %v1208_v31, %v1186_v43  ;;  %v1860_v43 = vld [vmem:[%s3241_s7 + $0x18] sm:$0xff] }
 0x13b   :  { %1873 = vmatpush.msrb.mxu2 %v1860_v43 }
 0x13c   :  { %v1232_v49 = vadd.f32 %v1231_v32, %v1209_v47 }
 0x13d   :  { %v1343_v35 = vpop.f32.mrf.mxu0  ;;  %v1366_v36 = vpop.f32.mrf.mxu1 }
 0x13e   :  { %v1255_v53 = vadd.f32 %v1254_v27, %v1232_v49 }
 0x140   :  { %v1278_v56 = vadd.f32 %v1277_v28, %v1255_v53 }
 0x141   :  { %v1297_v40 = vpop.f32.mrf.mxu2 }
 0x142   :  { %v1320_v42 = vpop.f32.mrf.mxu3  ;;  %v1298_v51 = vadd.f32 %v1297_v40, %v1275_v21 }
 0x144   :  { %v1321_v39 = vadd.f32 %v1320_v42, %v1298_v51  ;;  %v1826_v42 = vld [vmem:[%s3240_s6 + $0x18] sm:$0xff] }
 0x145   :  { %v1346_v44 = vpop.f32.mrf.mxu0  ;;  %v1369_v45 = vpop.f32.mrf.mxu1  ;;  %1846 = vmatpush.msra.mxu1 %v1826_v42 }
 0x146   :  { %v1344_v58 = vadd.f32 %v1343_v35, %v1321_v39 }
 0x148   :  { %v1367_v61 = vadd.f32 %v1366_v36, %v1344_v58 }
 0x149   :  { %v1300_v48 = vpop.f32.mrf.mxu2 }
 0x14a   :  { %v1323_v50 = vpop.f32.mrf.mxu3  ;;  %v1301_v59 = vadd.f32 %v1300_v48, %v1278_v56 }
 0x14c   :  { %v1324_v62 = vadd.f32 %v1323_v50, %v1301_v59 }
 0x14d   :  { %v1435_v52 = vpop.f32.mrf.mxu0  ;;  %v1458_v54 = vpop.f32.mrf.mxu1 }
 0x14e   :  { %v1347_v3 = vadd.f32 %v1346_v44, %v1324_v62  ;;  %v1887_v44 = vld [vmem:[%s3242_s8 + $0x18] sm:$0xff] }
 0x14f   :  { %1900 = vmatpush.msrb.mxu3 %v1887_v44 }
 0x150   :  { %v1370_v6 = vadd.f32 %v1369_v45, %v1347_v3 }
 0x151   :  { %v1389_v55 = vpop.f32.mrf.mxu2 }
 0x152   :  { %v1412_v57 = vpop.f32.mrf.mxu3  ;;  %v1390_v1 = vadd.f32 %v1389_v55, %v1367_v61 }
 0x154   :  { %v1413_v4 = vadd.f32 %v1412_v57, %v1390_v1 }
 0x155   :  { %v1438_v60 = vpop.f32.mrf.mxu0  ;;  %v1461_v0 = vpop.f32.mrf.mxu1 }
 0x156   :  { %v1436_v8 = vadd.f32 %v1435_v52, %v1413_v4 }
 0x158   :  { %v1459_v12 = vadd.f32 %v1458_v54, %v1436_v8  ;;  %v1825_v8 = vld [vmem:[%s3240_s6 + $0x10] sm:$0xff] }
 0x159   :  { %v1392_v63 = vpop.f32.mrf.mxu2  ;;  %1847 = vmatpush.msra.mxu1 %v1825_v8 }
 0x15a   :  { %v1415_v2 = vpop.f32.mrf.mxu3  ;;  %v1393_v9 = vadd.f32 %v1392_v63, %v1370_v6 }
 0x15c   :  { %v1416_v13 = vadd.f32 %v1415_v2, %v1393_v9  ;;  %v1859_v9 = vld [vmem:[%s3241_s7 + $0x10] sm:$0xff] }
 0x15d   :  { %v1527_v5 = vpop.f32.mrf.mxu0  ;;  %1874 = vmatpush.msrb.mxu2 %v1859_v9  ;;  %v2059_v9 = vld [vmem:[%s3243_s9] sm:$0xff] }
 0x15e   :  { %v1550_v11 = vpop.f32.mrf.mxu1  ;;  %v1439_v17 = vadd.f32 %v1438_v60, %v1416_v13  ;;  %v1885_v13 = vld [vmem:[%s3242_s8 + $0x8] sm:$0xff] }
 0x160   :  { %v1462_v22 = vadd.f32 %v1461_v0, %v1439_v17  ;;  %v2230_v17 = vld [vmem:[%s3238_s5] ss:$0 sm:$0xff] }
 0x161   :  { %v1481_v7 = vpop.f32.mrf.mxu2 }
 0x162   :  { %v1504_v10 = vpop.f32.mrf.mxu3  ;;  %v1482_v14 = vadd.f32 %v1481_v7, %v1459_v12  ;;  %v1858_v12 = vld [vmem:[%s3241_s7 + $0x8] sm:$0xff] }
 0x163   :  { %1875 = vmatpush.msrb.mxu2 %v1858_v12 }
 0x164   :  { %v1505_v19 = vadd.f32 %v1504_v10, %v1482_v14  ;;  %v1886_v10 = vld [vmem:[%s3242_s8 + $0x10] sm:$0xff]  ;;  %v1823_v14 = vld [vmem:[%s3240_s6] sm:$0xff] }
 0x165   :  { %v1530_v16 = vpop.f32.mrf.mxu0  ;;  %1901 = vmatpush.msrb.mxu3 %v1886_v10  ;;  %v2103_v10 = vld [vmem:[%s3245_s11 + $0x18] sm:$0xff] }
 0x166   :  { %v1553_v20 = vpop.f32.mrf.mxu1  ;;  %v1528_v23 = vadd.f32 %v1527_v5, %v1505_v19 }
 0x167   :  { %1902 = vmatpush.msrb.mxu3 %v1885_v13  ;;  %v2102_v13 = vld [vmem:[%s3245_s11 + $0x10] sm:$0xff] }
 0x168   :  { %v1551_v28 = vadd.f32 %v1550_v11, %v1528_v23  ;;  %v1824_v11 = vld [vmem:[%s3240_s6 + $0x8] sm:$0xff] }
 0x169   :  { %v1484_v15 = vpop.f32.mrf.mxu2  ;;  %1848 = vmatpush.msra.mxu1 %v1824_v11 }
 0x16a   :  { %v1507_v18 = vpop.f32.mrf.mxu3  ;;  %v1485_v24 = vadd.f32 %v1484_v15, %v1462_v22  ;;  %v1857_v15 = vld [vmem:[%s3241_s7] sm:$0xff] }
 0x16b   :  { %1849 = vmatpush.msra.mxu1 %v1823_v14  ;;  %1876 = vmatpush.msrb.mxu2 %v1857_v15  ;;  %v2101_v14 = vld [vmem:[%s3245_s11 + $0x8] sm:$0xff]  ;;  %v2100_v15 = vld [vmem:[%s3245_s11] sm:$0xff] }
 0x16c   :  { %v1508_v29 = vadd.f32 %v1507_v18, %v1485_v24 }
 0x16d   :  { %v1619_v27 = vpop.f32.mrf.mxu0 }
 0x16e   :  { %v1642_v32 = vpop.f32.mrf.mxu1  ;;  %v1531_v33 = vadd.f32 %v1530_v16, %v1508_v29  ;;  %v1884_v16 = vld [vmem:[%s3242_s8] sm:$0xff] }
 0x16f   :  { %1903 = vmatpush.msrb.mxu3 %v1884_v16  ;;  %v18_v16 = vstv %s3246_s12 }
 0x170   :  { %v1554_v37 = vadd.f32 %v1553_v20, %v1531_v33  ;;  %19 = vst [vmem:[#allocation2] sm:$0x1] %v18_v16 }
 0x171   :  { %v1573_v25 = vpop.f32.mrf.mxu2 }
 0x172   :  { %v1596_v26 = vpop.f32.mrf.mxu3  ;;  %v1574_v31 = vadd.f32 %v1573_v25, %v1551_v28 }
 0x174   :  { %v1597_v35 = vadd.f32 %v1596_v26, %v1574_v31 }
 0x175   :  { %v1622_v38 = vpop.f32.mrf.mxu0 }
 0x176   :  { %v1620_v40 = vadd.f32 %v1619_v27, %v1597_v35  ;;  %v1645_v45 = vpop.f32.mrf.mxu1 }
 0x178   :  { %v1643_v47 = vadd.f32 %v1642_v32, %v1620_v40 }
 0x179   :  { %v1576_v34 = vpop.f32.mrf.mxu2 }
 0x17a   :  { %v1599_v36 = vpop.f32.mrf.mxu3  ;;  %v1577_v41 = vadd.f32 %v1576_v34, %v1554_v37 }
 0x17c   :  { %v1600_v48 = vadd.f32 %v1599_v36, %v1577_v41 }
 0x17d   :  { %v1711_v51 = vpop.f32.mrf.mxu0 }
 0x17e   :  { %v1623_v50 = vadd.f32 %v1622_v38, %v1600_v48  ;;  %v1734_v55 = vpop.f32.mrf.mxu1 }
 0x180   :  { %v1646_v54 = vadd.f32 %v1645_v45, %v1623_v50  ;;  %v2060_v50 = vld [vmem:[%s3243_s9 + $0x8] sm:$0xff] }
 0x181   :  { %v1665_v46 = vpop.f32.mrf.mxu2 }
 0x182   :  { %v1688_v21 = vpop.f32.mrf.mxu3  ;;  %v1666_v49 = vadd.f32 %v1665_v46, %v1643_v47 }
 0x184   :  { %v1689_v52 = vadd.f32 %v1688_v21, %v1666_v49  ;;  %v2062_v21 = vld [vmem:[%s3243_s9 + $0x18] sm:$0xff]  ;;  %v2061_v49 = vld [vmem:[%s3243_s9 + $0x10] sm:$0xff] }
 0x185   :  { %v1714_v60 = vpop.f32.mrf.mxu0 }
 0x186   :  { %v1712_v56 = vadd.f32 %v1711_v51, %v1689_v52  ;;  %v1737_v2 = vpop.f32.mrf.mxu1 }
 0x188   :  { %v1735_v58 = vadd.f32 %v1734_v55, %v1712_v56 }
 0x189   :  { %v1668_v53 = vpop.f32.mrf.mxu2 }
 0x18a   :  { %v1691_v39 = vpop.f32.mrf.mxu3  ;;  %v1669_v57 = vadd.f32 %v1668_v53, %v1646_v54 }
 0x18c   :  { %v1692_v59 = vadd.f32 %v1691_v39, %v1669_v57 }
 0x18e   :  { %v1715_v0 = vadd.f32 %v1714_v60, %v1692_v59 }
 0x190   :  { %v1738_v3 = vadd.f32 %v1737_v2, %v1715_v0 }
 0x191   :  { %v1757_v61 = vpop.f32.mrf.mxu2 }
 0x192   :  { %v1758_v62 = vadd.f32 %v1757_v61, %v1735_v58  ;;  %v1780_v63 = vpop.f32.mrf.mxu3 }
 0x194   :  { %v1781_v1 = vadd.f32 %v1780_v63, %v1758_v62 }
 0x196   :  { %2208 = vmatmul.msk.f32.vlgmr.msra.gmra.mxu0 %vm1791_vm2, %v1781_v1 }
 0x199   :  { %v1760_v4 = vpop.f32.mrf.mxu2 }
 0x19a   :  { %v1761_v5 = vadd.f32 %v1760_v4, %v1738_v3  ;;  %v1783_v6 = vpop.f32.mrf.mxu3 }
 0x19c   :  { %v1784_v7 = vadd.f32 %v1783_v6, %v1761_v5 }
 0x19e   :  { %2209 = vmatmul.msk.f32.gmra.mxu0 %vm1791_vm2, %v1784_v7 }
 0x213   :  { %v1815_v18 = vpop.f32.mrf.mxu0 }
 0x214   :  { %v1816_v19 = vadd.f32 %v2230_v17, %v1815_v18 }
 0x216   :  { %v3166_v20 = vmax.f32 %v1816_v19, 0.0 }
 0x218   :  { %2210 = vmatmul.msk.f32.vlgmr.msra.gmra.mxu1 %vm1827_vm3, %v3166_v20  ;;  %2212 = vmatmul.msk.f32.vlgmr.msrb.gmra.mxu2 %vm1827_vm3, %v3166_v20 }
 0x219   :  { %2214 = vmatmul.msk.f32.vlgmr.msrb.gmra.mxu3 %vm1827_vm3, %v3166_v20 }
 0x21b   :  { %v1818_v22 = vpop.f32.mrf.mxu0 }
 0x21c   :  { %v1819_v23 = vadd.f32 %v2230_v17, %v1818_v22  ;;  %v2231_v17 = vld [vmem:[%s3244_s10] ss:$0 sm:$0xff] }
 0x21e   :  { %v3174_v24 = vmax.f32 %v1819_v23, 0.0 }
 0x220   :  { %2211 = vmatmul.msk.f32.gmra.mxu1 %vm1827_vm3, %v3174_v24  ;;  %2213 = vmatmul.msk.f32.gmra.mxu2 %vm1827_vm3, %v3174_v24 }
 0x221   :  { %2215 = vmatmul.msk.f32.gmra.mxu3 %vm1827_vm3, %v3174_v24 }
 0x295   :  { %v1851_v26 = vpop.f32.mrf.mxu1 }
 0x29b   :  { %v1878_v25 = vpop.f32.mrf.mxu2 }
 0x29c   :  { %v1905_v27 = vpop.f32.mrf.mxu3  ;;  %2216 = vmatpush.xpose.msk.msrb.mxu0 %vm1827_vm3, %v1878_v25 }
 0x29d   :  { %1980 = vmatpush.msrb.mxu1 %v1905_v27  ;;  %v1854_v30 = vpop.f32.mrf.mxu1  ;;  %v2232_v27 = vld [vmem:[#allocation2] ss:$0 sm:$0xff] }
 0x29f   :  { %2217 = vmatmul.msk.f32.vlgmr.msrb.gmra.mxu0 %vm1827_vm3, %v1851_v26  ;;  %2126 = vmatpush.msra.mxu1 %v2103_v10 }
 0x2a0   :  { %2081 = vmatpush.msra.mxu0 %v2062_v21 }
 0x2a1   :  { %2127 = vmatpush.msra.mxu1 %v2102_v13 }
 0x2a2   :  { %2082 = vmatpush.msra.mxu0 %v2061_v49 }
 0x2a3   :  { %v1881_v28 = vpop.f32.mrf.mxu2  ;;  %2128 = vmatpush.msra.mxu1 %v2101_v14 }
 0x2a4   :  { %v1908_v29 = vpop.f32.mrf.mxu3  ;;  %2219 = vmatpush.xpose.msk.msra.mxu2 %vm1827_vm3, %v1881_v28  ;;  %2083 = vmatpush.msra.mxu0 %v2060_v50 }
 0x2a5   :  { %2054 = vmatpush.msra.mxu3 %v1908_v29  ;;  %2129 = vmatpush.msra.mxu1 %v2100_v15 }
 0x2a6   :  { %2084 = vmatpush.msra.mxu0 %v2059_v9 }
 0x2a7   :  { %2220 = vmatmul.msk.f32.vlgmr.msra.gmra.mxu2 %vm1827_vm3, %v1854_v30 }
 0x31c   :  { %v1934_v31 = vpop.f32.mrf.mxu0 }
 0x31d   :  { %v1937_v32 = vmul.f32 0.17677669, %v1934_v31 }
 0x31f   :  { %v1938_v33 = vsel %vm1791_vm2, %v1937_v32, -inf }
 0x320   :  { %1939 = vmax.xlane.f32.xlu0 %v1938_v33 }
 0x32a   :  { %v2008_v34 = vpop.f32.mrf.mxu2 }
 0x32b   :  { %v2011_v35 = vmul.f32 0.17677669, %v2008_v34 }
 0x32d   :  { %v2012_v36 = vsel %vm1791_vm2, %v2011_v35, -inf }
 0x32e   :  { %2013 = vmax.xlane.f32.xlu1 %v2012_v36 }
 0x393   :  { %v1940_v37 = vpop.xlane.xlu0 %1939 }
 0x394   :  { %v1941_v38 = vsub.f32 %v1937_v32, %v1940_v37 }
 0x396   :  { %v1942_v40 = vmul.f32 1.442695, %v1941_v38 }
 0x398   :  { %2233 = vpow2.f32 %v1942_v40 }
 0x39e   :  { %v2234_v41 = vpop.eup %2233 }
 0x39f   :  { %v1944_v42 = vsel %vm1791_vm2, %v2234_v41, 0.0 }
 0x3a0   :  { %1945 = vadd.xlane.f32.xlu1 %v1944_v42 }
 0x3a1   :  { %v2014_v43 = vpop.xlane.xlu1 %2013 }
 0x3a2   :  { %v2015_v44 = vsub.f32 %v2011_v35, %v2014_v43 }
 0x3a4   :  { %v2016_v45 = vmul.f32 1.442695, %v2015_v44 }
 0x3a6   :  { %2235 = vpow2.f32 %v2016_v45 }
 0x3ac   :  { %v2236_v46 = vpop.eup %2235 }
 0x3ad   :  { %v2018_v47 = vsel %vm1791_vm2, %v2236_v46, 0.0 }
 0x3ae   :  { %2019 = vadd.xlane.f32.xlu2 %v2018_v47 }
 0x413   :  { %v1946_v48 = vpop.xlane.xlu1 %1945 }
 0x414   :  { %2237 = vrcp.f32 %v1946_v48  ;;  %v1958_v54 = vand.u32 2147483648, %v1946_v48  ;;  %v1956_v55 = vand.u32 2147483647, %v1946_v48  ;;  %vm1952_vm5 = vweird.f32 %v1946_v48 }
 0x416   :  { %v1959_v58 = vor.u32 1.1754944e-38, %v1958_v54  ;;  %vm1957_vm7 = vcmp.eq.f32.partialorder %v1956_v55, 8.507059e+37 }
 0x41a   :  { %v2238_v51 = vpop.eup %2237 }
 0x41b   :  { %v1948_v52 = vmul.f32 %v2238_v51, %v1946_v48  ;;  %vm1953_vm4 = vweird.f32 %v2238_v51 }
 0x41c   :  { %vm1954_vm6 = vmor %vm1952_vm5, %vm1953_vm4 }
 0x41d   :  { %v1949_v53 = vsub.f32 1.0, %v1948_v52 }
 0x41f   :  { %v1950_v39 = vmul.f32 %v2238_v51, %v1949_v53 }
 0x421   :  { %v1951_v56 = vadd.f32 %v2238_v51, %v1950_v39  ;;  %v2020_v57 = vpop.xlane.xlu2 %2019 }
 0x422   :  { %2239 = vrcp.f32 %v2020_v57  ;;  %v2032_v1 = vand.u32 2147483648, %v2020_v57  ;;  %v2030_v3 = vand.u32 2147483647, %v2020_v57  ;;  %vm2026_vm9 = vweird.f32 %v2020_v57 }
 0x423   :  { %v1955_v59 = vsel %vm1954_vm6, %v2238_v51, %v1951_v56 }
 0x424   :  { %v1960_v60 = vsel %vm1957_vm7, %v1959_v58, %v1955_v59  ;;  %v2033_v5 = vor.u32 1.1754944e-38, %v2032_v1  ;;  %vm2031_vm11 = vcmp.eq.f32.partialorder %v2030_v3, 8.507059e+37 }
 0x425   :  { %v1961_v61 = vmul.f32 %v2234_v41, %v1960_v60 }
 0x427   :  { %2218 = vmatmul.msk.f32.vlgmr.msrb.gmra.mxu1 %vm1791_vm2, %v1961_v61 }
 0x428   :  { %v2240_v62 = vpop.eup %2239 }
 0x429   :  { %v2022_v63 = vmul.f32 %v2240_v62, %v2020_v57  ;;  %vm2027_vm8 = vweird.f32 %v2240_v62 }
 0x42a   :  { %vm2028_vm10 = vmor %vm2026_vm9, %vm2027_vm8 }
 0x42b   :  { %v2023_v0 = vsub.f32 1.0, %v2022_v63 }
 0x42d   :  { %v2024_v2 = vmul.f32 %v2240_v62, %v2023_v0 }
 0x42f   :  { %v2025_v4 = vadd.f32 %v2240_v62, %v2024_v2 }
 0x431   :  { %v2029_v6 = vsel %vm2028_vm10, %v2240_v62, %v2025_v4 }
 0x432   :  { %v2034_v7 = vsel %vm2031_vm11, %v2033_v5, %v2029_v6 }
 0x433   :  { %v2035_v8 = vmul.f32 %v2236_v46, %v2034_v7 }
 0x435   :  { %2221 = vmatmul.msk.f32.vlgmr.msra.gmra.mxu3 %vm1791_vm2, %v2035_v8 }
 0x4a4   :  { %v1982_v11 = vpop.f32.mrf.mxu1 }
 0x4a5   :  { %2222 = vmatmul.msk.f32.vlgmr.msra.gmra.mxu0 %vm1827_vm3, %v1982_v11 }
 0x4b8   :  { %v2056_v12 = vpop.f32.mrf.mxu3 }
 0x4b9   :  { %2223 = vmatmul.msk.f32.gmra.mxu0 %vm1827_vm3, %v2056_v12 }
 0x522   :  { %v2086_v18 = vpop.f32.mrf.mxu0 }
 0x523   :  { %v2092_v19 = vadd.f32 %v2086_v18, %v3166_v20 }
 0x525   :  { %v2098_v22 = vadd.f32 %v2231_v17, %v2092_v19 }
 0x527   :  { %2224 = vmatmul.msk.f32.vlgmr.msra.gmra.mxu1 %vm1827_vm3, %v2098_v22 }
 0x536   :  { %v2089_v23 = vpop.f32.mrf.mxu0 }
 0x537   :  { %v2093_v25 = vadd.f32 %v2089_v23, %v3174_v24 }
 0x539   :  { %v2099_v26 = vadd.f32 %v2231_v17, %v2093_v25 }
 0x53b   :  { %2225 = vmatmul.msk.f32.gmra.mxu1 %vm1827_vm3, %v2099_v26 }
 0x5a4   :  { %v2131_v28 = vpop.f32.mrf.mxu1 }
 0x5a5   :  { %v2132_v29 = vadd.f32 %v2232_v27, %v2131_v28 }
 0x5a7   :  { %2138 = vst.msk [vmem:[%s3247_s13] sm:$0xff] %vm2137_vm12, %v2132_v29 }
 0x5b8   :  { %v2134_v30 = vpop.f32.mrf.mxu1 }
 0x5b9   :  { %v2135_v31 = vadd.f32 %v2232_v27, %v2134_v30 }
 0x5bb   :  { %2139 = vst.msk [vmem:[%s3247_s13 + $0x8] sm:$0xff] %vm2137_vm12, %v2135_v31 }

</bundles_post_ra>
